<compile_context>
chip_gen: v7x
topology: tpu7x:2x2x1
jax: 0.10.0
libtpu: 0.0.40
codegen_flags: <defaults>
</compile_context>

<pallas_src>
import jax
import jax.numpy as jnp
from jax import lax
from jax.experimental import pallas as pl
from jax.experimental.pallas import tpu as pltpu


def mlp_kernel(x_ref, w1_ref, b1_ref, dww_ref, dwb_ref, w2_ref, b2_ref,
               o_ref, hid_ref):
    # Block shapes (batch dim squeezed out):
    #   x_ref   : (H*W, Cin)          flattened spatial, channels on lanes
    #   w1_ref  : (Cin, Cp)           BN scale folded in, lane-padded
    #   b1_ref  : (1, Cp)
    #   dww_ref : (9, Cp)             depthwise 3x3 taps, row-major
    #   dwb_ref : (1, Cp)
    #   w2_ref  : (Cp, Cop)           BN scale folded in, lane-padded
    #   b2_ref  : (1, Cop)
    #   o_ref   : (H*W, Cop)          lane-dense output slab
    #   hid_ref : (H+2, W+2, Cp) f32  zero-haloed fc1 output (scratch)
    Hp2, Wp2, Cp = hid_ref.shape
    H, W = Hp2 - 2, Wp2 - 2
    HW = x_ref.shape[0]

    # ---- fc1: 1x1 conv + folded BN (single MXU matmul, N lane-dense) ----
    hid = jnp.dot(x_ref[...], w1_ref[...],
                  preferred_element_type=jnp.float32) + b1_ref[...]

    # ---- materialize zero-padded halo once; interior <- fc1 output ----
    hid_ref[...] = jnp.zeros_like(hid_ref)
    hid_ref[1:H + 1, 1:W + 1, :] = hid.reshape(H, W, Cp)

    # ---- 3x3 depthwise conv (stride 1, pad 1): register accumulator over
    #      9 full (H, W, Cp) windows of the haloed buffer ----
    taps = dww_ref[...]                       # (9, Cp), loaded once
    acc = taps[0] * hid_ref[0:H, 0:W, :]
    for k in range(1, 9):
        i, j = divmod(k, 3)
        acc = acc + taps[k] * hid_ref[i:i + H, j:j + W, :]

    # ---- fused bias + ReLU on the register accumulator (dropout p=0) ----
    act = jnp.maximum(acc + dwb_ref[...], 0.0)

    # ---- fc2: 1x1 conv + folded BN; lane-dense (HW, Cop) store ----
    out = jnp.dot(act.reshape(HW, Cp), w2_ref[...],
                  preferred_element_type=jnp.float32) + b2_ref[...]
    o_ref[...] = out.astype(o_ref.dtype)


def _round_up(x, m):
    return (x + m - 1) // m * m


def mlp_pallas(x_nhwc, w1f, b1, dww, dwb, w2f, b2, *, lane=128):
    B, H, W, Cin = x_nhwc.shape
    Chid = w1f.shape[1]
    Cout = w2f.shape[1]
    Cp = _round_up(Chid, lane)
    Cop = _round_up(Cout, lane)

    # Zero-pad channel dims to lane multiples so every MXU tile / VPU op /
    # output store is full-lane; padding is sliced off after the call.
    w1p = jnp.pad(w1f, ((0, 0), (0, Cp - Chid)))
    b1p = jnp.pad(b1.reshape(1, Chid), ((0, 0), (0, Cp - Chid)))
    dwwp = jnp.pad(dww.reshape(9, Chid), ((0, 0), (0, Cp - Chid)))
    dwbp = jnp.pad(dwb.reshape(1, Chid), ((0, 0), (0, Cp - Chid)))
    w2p = jnp.pad(w2f, ((0, Cp - Chid), (0, Cop - Cout)))
    b2p = jnp.pad(b2.reshape(1, Cout), ((0, 0), (0, Cop - Cout)))

    # Flattened-spatial presentation keeps channels on lanes and makes the
    # output a lane-dense (HW, Cop) slab.
    x2 = x_nhwc.reshape(B, H * W, Cin)

    full = lambda a: pl.BlockSpec(a.shape, lambda b: (0,) * a.ndim)

    out2 = pl.pallas_call(
        mlp_kernel,
        out_shape=jax.ShapeDtypeStruct((B, H * W, Cop), x_nhwc.dtype),
        grid_spec=pltpu.PrefetchScalarGridSpec(
            num_scalar_prefetch=0,
            grid=(B,),
            in_specs=[
                pl.BlockSpec((None, H * W, Cin), lambda b: (b, 0, 0)),
                full(w1p), full(b1p), full(dwwp), full(dwbp),
                full(w2p), full(b2p),
            ],
            out_specs=pl.BlockSpec((None, H * W, Cop), lambda b: (b, 0, 0)),
            scratch_shapes=[pltpu.VMEM((H + 2, W + 2, Cp), jnp.float32)],
        ),
        compiler_params=pltpu.CompilerParams(
            dimension_semantics=("parallel",)),
    )(x2, w1p, b1p, dwwp, dwbp, w2p, b2p)

    return out2[:, :, :Cout].reshape(B, H, W, Cout)


def reference(x_nhwc, w1f, b1, dww, dwb, w2f, b2):
    Chid = w1f.shape[1]
    hid = jnp.einsum("bhwc,cd->bhwd", x_nhwc, w1f) + b1.reshape(1, 1, 1, -1)
    dw_hwio = dww.reshape(3, 3, 1, Chid)
    conv = lax.conv_general_dilated(
        hid, dw_hwio, window_strides=(1, 1), padding="SAME",
        dimension_numbers=("NHWC", "HWIO", "NHWC"),
        feature_group_count=Chid)
    act = jnp.maximum(conv + dwb.reshape(1, 1, 1, -1), 0.0)
    out = jnp.einsum("bhwd,de->bhwe", act, w2f) + b2.reshape(1, 1, 1, -1)
    return out


if __name__ == "__main__":
    key = jax.random.PRNGKey(0)
    B, Cin, H, W = 2, 4, 16, 16
    Chid = 32
    Cout = Cin  # out_features defaults to in_features

    ks = jax.random.split(key, 12)
    # Input (PyTorch-style NCHW), then move to NHWC so channels sit on lanes.
    x_nchw = jax.random.normal(ks[0], (B, Cin, H, W), dtype=jnp.float32)
    x_nhwc = jnp.transpose(x_nchw, (0, 2, 3, 1))

    # fc1: Conv2d(Cin, Chid, 1, bias=False) + BN(Chid)
    w1 = jax.random.normal(ks[1], (Cin, Chid), jnp.float32) * 0.1
    bn1_gamma = 1.0 + 0.1 * jax.random.normal(ks[2], (Chid,), jnp.float32)
    bn1_beta = 0.1 * jax.random.normal(ks[3], (Chid,), jnp.float32)
    bn1_mean = 0.05 * jax.random.normal(ks[4], (Chid,), jnp.float32)
    bn1_var = 1.0 + 0.1 * jax.random.uniform(ks[5], (Chid,), jnp.float32)

    # dwconv: Conv2d(Chid, Chid, 3, 1, 1, groups=Chid, bias=True)
    dw_w = jax.random.normal(ks[6], (3, 3, Chid), jnp.float32) * 0.1
    dw_b = 0.1 * jax.random.normal(ks[7], (Chid,), jnp.float32)

    # fc2: Conv2d(Chid, Cout, 1, bias=False) + BN(Cout)
    w2 = jax.random.normal(ks[8], (Chid, Cout), jnp.float32) * 0.1
    bn2_gamma = 1.0 + 0.1 * jax.random.normal(ks[9], (Cout,), jnp.float32)
    bn2_beta = 0.1 * jax.random.normal(ks[10], (Cout,), jnp.float32)
    bn2_mean = 0.05 * jax.random.normal(ks[11], (Cout,), jnp.float32)
    bn2_var = jnp.ones((Cout,), jnp.float32)

    eps = 1e-5
    # Fold BN (inference mode) into the 1x1 convs: y = conv(x)*scale + bias
    s1 = bn1_gamma / jnp.sqrt(bn1_var + eps)
    w1f = w1 * s1[None, :]
    b1 = (bn1_beta - bn1_mean * s1).reshape(1, Chid)
    s2 = bn2_gamma / jnp.sqrt(bn2_var + eps)
    w2f = w2 * s2[None, :]
    b2 = (bn2_beta - bn2_mean * s2).reshape(1, Cout)

    dww = dw_w.reshape(9, Chid)
    dwb = dw_b.reshape(1, Chid)

    out = mlp_pallas(x_nhwc, w1f, b1, dww, dwb, w2f, b2)
    out = jax.block_until_ready(out)

    ref = reference(x_nhwc, w1f, b1, dww, dw_b, w2f, b2)
    assert out.shape == (B, H, W, Cout)
    assert jnp.allclose(out, ref, atol=1e-4, rtol=1e-4), "mismatch vs reference"

    # TODO(synk): Dropout(p=0.0) is an identity in eval; BN uses inference
    # (running-stat) semantics folded into the pointwise conv weights.
    print("KERNEL_OK")
</pallas_src>

<mosaic_0001>
module attributes {stable_mosaic.version = 11 : i64} {
  func.func @mlp_kernel(%arg0: i32, %arg1: memref<1x256x4xf32, #tpu.memory_space<vmem>>, %arg2: memref<4x128xf32, #tpu.memory_space<vmem>>, %arg3: memref<1x128xf32, #tpu.memory_space<vmem>>, %arg4: memref<9x128xf32, #tpu.memory_space<vmem>>, %arg5: memref<1x128xf32, #tpu.memory_space<vmem>>, %arg6: memref<128x128xf32, #tpu.memory_space<vmem>>, %arg7: memref<1x128xf32, #tpu.memory_space<vmem>>, %arg8: memref<1x256x128xf32, #tpu.memory_space<vmem>>, %arg9: memref<18x18x128xf32, #tpu.memory_space<vmem>>) attributes {dimension_semantics = [#tpu.dimension_semantics<parallel>], iteration_bounds = array<i64: 2>, scalar_prefetch = 0 : i64, scratch_operands = 1 : i64, tpu.core_type = #tpu.core_type<tc>, window_params = [{transform_indices = @transform_0, window_bounds = array<i64: 1, 256, 4>}, {pipeline_mode = #tpu.pipeline_mode<synchronous>, transform_indices = @transform_1, window_bounds = array<i64: 4, 128>}, {pipeline_mode = #tpu.pipeline_mode<synchronous>, transform_indices = @transform_2, window_bounds = array<i64: 1, 128>}, {pipeline_mode = #tpu.pipeline_mode<synchronous>, transform_indices = @transform_3, window_bounds = array<i64: 9, 128>}, {pipeline_mode = #tpu.pipeline_mode<synchronous>, transform_indices = @transform_4, window_bounds = array<i64: 1, 128>}, {pipeline_mode = #tpu.pipeline_mode<synchronous>, transform_indices = @transform_5, window_bounds = array<i64: 128, 128>}, {pipeline_mode = #tpu.pipeline_mode<synchronous>, transform_indices = @transform_6, window_bounds = array<i64: 1, 128>}, {transform_indices = @transform_7, window_bounds = array<i64: 1, 256, 128>}]} {
    %c0 = arith.constant 0 : index
    %c0_0 = arith.constant 0 : index
    %c0_1 = arith.constant 0 : index
    %0 = vector.load %arg1[%c0, %c0_0, %c0_1] : memref<1x256x4xf32, #tpu.memory_space<vmem>>, vector<1x256x4xf32>
    %1 = vector.shape_cast %0 : vector<1x256x4xf32> to vector<256x4xf32>
    %c0_2 = arith.constant 0 : index
    %c0_3 = arith.constant 0 : index
    %2 = vector.load %arg2[%c0_2, %c0_3] : memref<4x128xf32, #tpu.memory_space<vmem>>, vector<4x128xf32>
    %cst = arith.constant dense<0.000000e+00> : vector<256x128xf32>
    %3 = tpu.matmul %1, %2, %cst {dimension_numbers = #tpu.dot_dimension_numbers<[1], [0], [0], [1], [0, 0, 1, 1], [], []>} : vector<256x4xf32>, vector<4x128xf32>, vector<256x128xf32> -> vector<256x128xf32>
    %c0_4 = arith.constant 0 : index
    %c0_5 = arith.constant 0 : index
    %4 = vector.load %arg3[%c0_4, %c0_5] : memref<1x128xf32, #tpu.memory_space<vmem>>, vector<1x128xf32>
    %5 = vector.broadcast %4 : vector<1x128xf32> to vector<256x128xf32>
    %6 = arith.addf %3, %5 : vector<256x128xf32>
    %cst_6 = arith.constant 0.000000e+00 : f32
    %7 = vector.broadcast %cst_6 : f32 to vector<18x18x128xf32>
    %c0_7 = arith.constant 0 : index
    %c0_8 = arith.constant 0 : index
    %c0_9 = arith.constant 0 : index
    %8 = vector.load %arg9[%c0_7, %c0_8, %c0_9] : memref<18x18x128xf32, #tpu.memory_space<vmem>>, vector<18x18x128xf32>
    tpu.vector_store %arg9[%c0_7, %c0_8, %c0_9], %7 {strides = array<i32>} : memref<18x18x128xf32, #tpu.memory_space<vmem>>, vector<18x18x128xf32>,
    %9 = vector.shape_cast %6 : vector<256x128xf32> to vector<16x16x128xf32>
    %c1 = arith.constant 1 : index
    %c1_10 = arith.constant 1 : index
    %c0_11 = arith.constant 0 : index
    %10 = vector.load %arg9[%c1, %c1_10, %c0_11] : memref<18x18x128xf32, #tpu.memory_space<vmem>>, vector<16x16x128xf32>
    tpu.vector_store %arg9[%c1, %c1_10, %c0_11], %9 {strides = array<i32>} : memref<18x18x128xf32, #tpu.memory_space<vmem>>, vector<16x16x128xf32>,
    %c0_12 = arith.constant 0 : index
    %c0_13 = arith.constant 0 : index
    %11 = vector.load %arg4[%c0_12, %c0_13] : memref<9x128xf32, #tpu.memory_space<vmem>>, vector<9x128xf32>
    %12 = vector.extract_strided_slice %11 {offsets = [0, 0], sizes = [1, 128], strides = [1, 1]} : vector<9x128xf32> to vector<1x128xf32>
    %13 = vector.shape_cast %12 : vector<1x128xf32> to vector<128xf32>
    %c0_14 = arith.constant 0 : index
    %c0_15 = arith.constant 0 : index
    %c0_16 = arith.constant 0 : index
    %14 = vector.load %arg9[%c0_14, %c0_15, %c0_16] : memref<18x18x128xf32, #tpu.memory_space<vmem>>, vector<16x16x128xf32>
    %15 = vector.shape_cast %13 : vector<128xf32> to vector<1x1x128xf32>
    %16 = vector.broadcast %15 : vector<1x1x128xf32> to vector<16x16x128xf32>
    %17 = arith.mulf %16, %14 : vector<16x16x128xf32>
    %18 = vector.extract_strided_slice %11 {offsets = [1, 0], sizes = [1, 128], strides = [1, 1]} : vector<9x128xf32> to vector<1x128xf32>
    %19 = vector.shape_cast %18 : vector<1x128xf32> to vector<128xf32>
    %c0_17 = arith.constant 0 : index
    %c1_18 = arith.constant 1 : index
    %c0_19 = arith.constant 0 : index
    %20 = vector.load %arg9[%c0_17, %c1_18, %c0_19] : memref<18x18x128xf32, #tpu.memory_space<vmem>>, vector<16x16x128xf32>
    %21 = vector.shape_cast %19 : vector<128xf32> to vector<1x1x128xf32>
    %22 = vector.broadcast %21 : vector<1x1x128xf32> to vector<16x16x128xf32>
    %23 = arith.mulf %22, %20 : vector<16x16x128xf32>
    %24 = arith.addf %17, %23 : vector<16x16x128xf32>
    %25 = vector.extract_strided_slice %11 {offsets = [2, 0], sizes = [1, 128], strides = [1, 1]} : vector<9x128xf32> to vector<1x128xf32>
    %26 = vector.shape_cast %25 : vector<1x128xf32> to vector<128xf32>
    %c0_20 = arith.constant 0 : index
    %c2 = arith.constant 2 : index
    %c0_21 = arith.constant 0 : index
    %27 = vector.load %arg9[%c0_20, %c2, %c0_21] : memref<18x18x128xf32, #tpu.memory_space<vmem>>, vector<16x16x128xf32>
    %28 = vector.shape_cast %26 : vector<128xf32> to vector<1x1x128xf32>
    %29 = vector.broadcast %28 : vector<1x1x128xf32> to vector<16x16x128xf32>
    %30 = arith.mulf %29, %27 : vector<16x16x128xf32>
    %31 = arith.addf %24, %30 : vector<16x16x128xf32>
    %32 = vector.extract_strided_slice %11 {offsets = [3, 0], sizes = [1, 128], strides = [1, 1]} : vector<9x128xf32> to vector<1x128xf32>
    %33 = vector.shape_cast %32 : vector<1x128xf32> to vector<128xf32>
    %c1_22 = arith.constant 1 : index
    %c0_23 = arith.constant 0 : index
    %c0_24 = arith.constant 0 : index
    %34 = vector.load %arg9[%c1_22, %c0_23, %c0_24] : memref<18x18x128xf32, #tpu.memory_space<vmem>>, vector<16x16x128xf32>
    %35 = vector.shape_cast %33 : vector<128xf32> to vector<1x1x128xf32>
    %36 = vector.broadcast %35 : vector<1x1x128xf32> to vector<16x16x128xf32>
    %37 = arith.mulf %36, %34 : vector<16x16x128xf32>
    %38 = arith.addf %31, %37 : vector<16x16x128xf32>
    %39 = vector.extract_strided_slice %11 {offsets = [4, 0], sizes = [1, 128], strides = [1, 1]} : vector<9x128xf32> to vector<1x128xf32>
    %40 = vector.shape_cast %39 : vector<1x128xf32> to vector<128xf32>
    %c1_25 = arith.constant 1 : index
    %c1_26 = arith.constant 1 : index
    %c0_27 = arith.constant 0 : index
    %41 = vector.load %arg9[%c1_25, %c1_26, %c0_27] : memref<18x18x128xf32, #tpu.memory_space<vmem>>, vector<16x16x128xf32>
    %42 = vector.shape_cast %40 : vector<128xf32> to vector<1x1x128xf32>
    %43 = vector.broadcast %42 : vector<1x1x128xf32> to vector<16x16x128xf32>
    %44 = arith.mulf %43, %41 : vector<16x16x128xf32>
    %45 = arith.addf %38, %44 : vector<16x16x128xf32>
    %46 = vector.extract_strided_slice %11 {offsets = [5, 0], sizes = [1, 128], strides = [1, 1]} : vector<9x128xf32> to vector<1x128xf32>
    %47 = vector.shape_cast %46 : vector<1x128xf32> to vector<128xf32>
    %c1_28 = arith.constant 1 : index
    %c2_29 = arith.constant 2 : index
    %c0_30 = arith.constant 0 : index
    %48 = vector.load %arg9[%c1_28, %c2_29, %c0_30] : memref<18x18x128xf32, #tpu.memory_space<vmem>>, vector<16x16x128xf32>
    %49 = vector.shape_cast %47 : vector<128xf32> to vector<1x1x128xf32>
    %50 = vector.broadcast %49 : vector<1x1x128xf32> to vector<16x16x128xf32>
    %51 = arith.mulf %50, %48 : vector<16x16x128xf32>
    %52 = arith.addf %45, %51 : vector<16x16x128xf32>
    %53 = vector.extract_strided_slice %11 {offsets = [6, 0], sizes = [1, 128], strides = [1, 1]} : vector<9x128xf32> to vector<1x128xf32>
    %54 = vector.shape_cast %53 : vector<1x128xf32> to vector<128xf32>
    %c2_31 = arith.constant 2 : index
    %c0_32 = arith.constant 0 : index
    %c0_33 = arith.constant 0 : index
    %55 = vector.load %arg9[%c2_31, %c0_32, %c0_33] : memref<18x18x128xf32, #tpu.memory_space<vmem>>, vector<16x16x128xf32>
    %56 = vector.shape_cast %54 : vector<128xf32> to vector<1x1x128xf32>
    %57 = vector.broadcast %56 : vector<1x1x128xf32> to vector<16x16x128xf32>
    %58 = arith.mulf %57, %55 : vector<16x16x128xf32>
    %59 = arith.addf %52, %58 : vector<16x16x128xf32>
    %60 = vector.extract_strided_slice %11 {offsets = [7, 0], sizes = [1, 128], strides = [1, 1]} : vector<9x128xf32> to vector<1x128xf32>
    %61 = vector.shape_cast %60 : vector<1x128xf32> to vector<128xf32>
    %c2_34 = arith.constant 2 : index
    %c1_35 = arith.constant 1 : index
    %c0_36 = arith.constant 0 : index
    %62 = vector.load %arg9[%c2_34, %c1_35, %c0_36] : memref<18x18x128xf32, #tpu.memory_space<vmem>>, vector<16x16x128xf32>
    %63 = vector.shape_cast %61 : vector<128xf32> to vector<1x1x128xf32>
    %64 = vector.broadcast %63 : vector<1x1x128xf32> to vector<16x16x128xf32>
    %65 = arith.mulf %64, %62 : vector<16x16x128xf32>
    %66 = arith.addf %59, %65 : vector<16x16x128xf32>
    %67 = vector.extract_strided_slice %11 {offsets = [8, 0], sizes = [1, 128], strides = [1, 1]} : vector<9x128xf32> to vector<1x128xf32>
    %68 = vector.shape_cast %67 : vector<1x128xf32> to vector<128xf32>
    %c2_37 = arith.constant 2 : index
    %c2_38 = arith.constant 2 : index
    %c0_39 = arith.constant 0 : index
    %69 = vector.load %arg9[%c2_37, %c2_38, %c0_39] : memref<18x18x128xf32, #tpu.memory_space<vmem>>, vector<16x16x128xf32>
    %70 = vector.shape_cast %68 : vector<128xf32> to vector<1x1x128xf32>
    %71 = vector.broadcast %70 : vector<1x1x128xf32> to vector<16x16x128xf32>
    %72 = arith.mulf %71, %69 : vector<16x16x128xf32>
    %73 = arith.addf %66, %72 : vector<16x16x128xf32>
    %c0_40 = arith.constant 0 : index
    %c0_41 = arith.constant 0 : index
    %74 = vector.load %arg5[%c0_40, %c0_41] : memref<1x128xf32, #tpu.memory_space<vmem>>, vector<1x128xf32>
    %75 = vector.shape_cast %74 : vector<1x128xf32> to vector<1x1x128xf32>
    %76 = vector.broadcast %75 : vector<1x1x128xf32> to vector<16x16x128xf32>
    %77 = arith.addf %73, %76 : vector<16x16x128xf32>
    %cst_42 = arith.constant 0.000000e+00 : f32
    %78 = vector.broadcast %cst_42 : f32 to vector<16x16x128xf32>
    %79 = arith.maximumf %77, %78 : vector<16x16x128xf32>
    %80 = vector.shape_cast %79 : vector<16x16x128xf32> to vector<256x128xf32>
    %c0_43 = arith.constant 0 : index
    %c0_44 = arith.constant 0 : index
    %81 = vector.load %arg6[%c0_43, %c0_44] : memref<128x128xf32, #tpu.memory_space<vmem>>, vector<128x128xf32>
    %cst_45 = arith.constant dense<0.000000e+00> : vector<256x128xf32>
    %82 = tpu.matmul %80, %81, %cst_45 {dimension_numbers = #tpu.dot_dimension_numbers<[1], [0], [0], [1], [0, 0, 1, 1], [], []>} : vector<256x128xf32>, vector<128x128xf32>, vector<256x128xf32> -> vector<256x128xf32>
    %c0_46 = arith.constant 0 : index
    %c0_47 = arith.constant 0 : index
    %83 = vector.load %arg7[%c0_46, %c0_47] : memref<1x128xf32, #tpu.memory_space<vmem>>, vector<1x128xf32>
    %84 = vector.broadcast %83 : vector<1x128xf32> to vector<256x128xf32>
    %85 = arith.addf %82, %84 : vector<256x128xf32>
    %c0_48 = arith.constant 0 : index
    %c0_49 = arith.constant 0 : index
    %c0_50 = arith.constant 0 : index
    %86 = vector.load %arg8[%c0_48, %c0_49, %c0_50] : memref<1x256x128xf32, #tpu.memory_space<vmem>>, vector<1x256x128xf32>
    %87 = vector.shape_cast %86 : vector<1x256x128xf32> to vector<256x128xf32>
    %88 = vector.shape_cast %85 : vector<256x128xf32> to vector<1x256x128xf32>
    tpu.vector_store %arg8[%c0_48, %c0_49, %c0_50], %88 {strides = array<i32>} : memref<1x256x128xf32, #tpu.memory_space<vmem>>, vector<1x256x128xf32>,
    return
  }
  func.func @transform_0(%arg0: i32) -> (i32, i32, i32) {
    %c0_i32 = arith.constant 0 : i32
    %c0_i32_0 = arith.constant 0 : i32
    %c0_i32_1 = arith.constant 0 : i32
    return %arg0, %c0_i32, %c0_i32_0 : i32, i32, i32
  }
  func.func @transform_1(%arg0: i32) -> (i32, i32) {
    %c0_i32 = arith.constant 0 : i32
    %c0_i32_0 = arith.constant 0 : i32
    %c0_i32_1 = arith.constant 0 : i32
    return %c0_i32, %c0_i32_0 : i32, i32
  }
  func.func @transform_2(%arg0: i32) -> (i32, i32) {
    %c0_i32 = arith.constant 0 : i32
    %c0_i32_0 = arith.constant 0 : i32
    %c0_i32_1 = arith.constant 0 : i32
    return %c0_i32, %c0_i32_0 : i32, i32
  }
  func.func @transform_3(%arg0: i32) -> (i32, i32) {
    %c0_i32 = arith.constant 0 : i32
    %c0_i32_0 = arith.constant 0 : i32
    %c0_i32_1 = arith.constant 0 : i32
    return %c0_i32, %c0_i32_0 : i32, i32
  }
  func.func @transform_4(%arg0: i32) -> (i32, i32) {
    %c0_i32 = arith.constant 0 : i32
    %c0_i32_0 = arith.constant 0 : i32
    %c0_i32_1 = arith.constant 0 : i32
    return %c0_i32, %c0_i32_0 : i32, i32
  }
  func.func @transform_5(%arg0: i32) -> (i32, i32) {
    %c0_i32 = arith.constant 0 : i32
    %c0_i32_0 = arith.constant 0 : i32
    %c0_i32_1 = arith.constant 0 : i32
    return %c0_i32, %c0_i32_0 : i32, i32
  }
  func.func @transform_6(%arg0: i32) -> (i32, i32) {
    %c0_i32 = arith.constant 0 : i32
    %c0_i32_0 = arith.constant 0 : i32
    %c0_i32_1 = arith.constant 0 : i32
    return %c0_i32, %c0_i32_0 : i32, i32
  }
  func.func @transform_7(%arg0: i32) -> (i32, i32, i32) {
    %c0_i32 = arith.constant 0 : i32
    %c0_i32_0 = arith.constant 0 : i32
    %c0_i32_1 = arith.constant 0 : i32
    return %arg0, %c0_i32, %c0_i32_0 : i32, i32, i32
  }
}

</mosaic_0001>

<bundles_post_ra>
// kernel: tpu_custom_call.1
= control target key start
LH: loop header
LB: loop body
LE: loop exit
PB: predicated region body
PF: predicated region fallthrough
CT: control target
= control target key end

     0   :  { %12 = vsyncpa [#allocation4], 0  ;;  %s3540_s0 = inlined_call_operand.vmem [shape: f32[2,256,4], index: 0, kind: input, shape index: {}]   ;;  %s3541_s1 = inlined_call_operand.vmem [shape: f32[4,128], index: 1, kind: input, shape index: {}]   ;;  %s3542_s2 = inlined_call_operand.vmem [shape: f32[1,128], index: 2, kind: input, shape index: {}]   ;;  %s3543_s3 = inlined_call_operand.vmem [shape: f32[9,128], index: 3, kind: input, shape index: {}]   ;;  %s3544_s4 = inlined_call_operand.vmem [shape: f32[1,128], index: 4, kind: input, shape index: {}]   ;;  %s3545_s5 = inlined_call_operand.vmem [shape: f32[128,128], index: 5, kind: input, shape index: {}]   ;;  %s3546_s6 = inlined_call_operand.vmem [shape: f32[1,128], index: 6, kind: input, shape index: {}]   ;;  %s3547_s7 = inlined_call_operand.hbm [shape: f32[2,256,128], index: 7, kind: output, shape index: {}]  }
   0x1   :  { %14 = vsyncpa [#allocation4 + $0x1], 0  ;;  %s2491_s24 = smov 0   ;;  %s2493_s25 = smov 0  }
   0x2   :  { %s2495_s26 = smov 0   ;;  %s2497_s27 = smov 0  }
   0x3 LB: > { %s2512_s28 = sadd.s32 4294967295, %s2445_s27   ;;  %s2028_s29 = sadd.s32 4294967294, %s2445_s27   ;;  %s2445_s27 = sphi %s2497_s27, %s3553_s27   ;;  %s2441_s26 = sphi %s2495_s26, %s3552_s26   ;;  %s2437_s25 = sphi %s2493_s25, %s3551_s25   ;;  %s2433_s24 = sphi %s2491_s24, %s3550_s24  }
   0x4   : > { %s2516_s30 = sadd.s32 1, %s2445_s27   ;;  %s179_s8 = sadd.s32 1, %s2441_s26 }
   0x5   : > { %s176_s9 = ssub.s32 %s2445_s27, %s2516_s30  ;;  %p189_p0 = scmp.ne.s32.totalorder %s2441_s26, %s2437_s25 }
   0x6   : > { %p177_p1 = scmp.eq.s32.totalorder %s176_s9, 0  ;;  %p190_p2 = scmp.eq.s32.totalorder %s2512_s28, 1 }
   0x7   : > { %p195_p3 = scmp.ne.s32.totalorder %s2437_s25, %s2433_s24  ;;  %p196_p4 = scmp.eq.s32.totalorder %s2028_s29, 1 }
   0x8   : > { %s2527_s10 = scalar_select %p177_p1, %s2441_s26, %s179_s8  }
   0x9   : > { %p2529_p5 = por %p190_p2, %p189_p0  ;;  %p2533_p6 = por %p196_p4, %p195_p3 }
   0xa   : > { %p2031_p7 = scmp.ge.s32.totalorder %s2445_s27, 1  ;;  %p240_p8 = scmp.lt.s32.totalorder %s2445_s27, 3 }
   0xc   : > { %p241_p9 = pnand %p2031_p7, %p240_p8 }
   0xd   : > { %v309_v0 = vld [vmem:[%s3541_s1] sm:$0xf] (!%p241_p9)  ;;  %vm414_vm0 = vcmask (!%p241_p9), 1043456   ;;  %p272_p10 = scmp.lt.s32.totalorder (!%p241_p9), %s2512_s28, 1  ;;  %v1673_v2 = vld [vmem:[%s3545_s5 + $0x8] sm:$0xff] (!%p241_p9)  ;;  %vm317_vm1 = vcmask (!%p241_p9), 31744   ;;  %v764_v58 = vlaneseq (!%p241_p9) }
   0xe   : > { %244 = sbr.rel (%p241_p9) target bundleno = 645 (0x285), region = 48  ;;  %v1672_v1 = vld [vmem:[%s3545_s5] sm:$0xff] (!%p241_p9)  ;;  %2160 = vmatprep.subr.msk.mxu0 (!%p241_p9), %vm414_vm0, %v309_v0  ;;  %v2447_v36 = vmov (!%p241_p9), 0.0   ;;  %v1674_v37 = vld [vmem:[%s3545_s5 + $0x10] sm:$0xff] (!%p241_p9)  ;;  %v1675_v38 = vld [vmem:[%s3545_s5 + $0x18] sm:$0xff] (!%p241_p9)  ;;  %s269_s22 = sand.u32 (!%p241_p9), 1, %s2437_s25  }
   0xf   : > { %2161 = vmatpush3.msk.msra.mxu0 (!%p241_p9), %vm414_vm0, %v309_v0  ;;  %v2290_v3 = vpack.c.bf16 (!%p241_p9), %v1673_v2, %v1672_v1  ;;  %647 = vst [vmem:[#allocation2 + $0x20] sm:$0xff] (!%p241_p9), %v2447_v36  ;;  %648 = vst [vmem:[#allocation2 + $0x28] sm:$0x3] (!%p241_p9), %v2447_v36  ;;  %v2294_v39 = vpack.c.bf16 (!%p241_p9), %v1675_v38, %v1674_v37  ;;  %v1676_v40 = vld [vmem:[%s3545_s5 + $0x20] sm:$0xff] (!%p241_p9)  ;;  %v1677_v41 = vld [vmem:[%s3545_s5 + $0x28] sm:$0xff] (!%p241_p9)  ;;  %v765_v59 = vshrl.u32 (!%p241_p9), %v764_v58, 7 }
  0x10   : > { %643 = vst [vmem:[#allocation2] sm:$0xff] (!%p241_p9), %v2447_v36  ;;  %644 = vst [vmem:[#allocation2 + $0x8] sm:$0xff] (!%p241_p9), %v2447_v36  ;;  %v2298_v42 = vpack.c.bf16 (!%p241_p9), %v1677_v41, %v1676_v40  ;;  %v1678_v43 = vld [vmem:[%s3545_s5 + $0x30] sm:$0xff] (!%p241_p9)  ;;  %v1679_v44 = vld [vmem:[%s3545_s5 + $0x38] sm:$0xff] (!%p241_p9)  ;;  %s2078_s13 = sshll.u32 (!%p241_p9), %s2512_s28, 12 }
  0x11   : > { %2291 = vmatprep.subr.bf16.mxu0 (!%p241_p9), %v2290_v3  ;;  %2322 = vmatprep.subr.bf16.mxu1 (!%p241_p9), %v2290_v3  ;;  %645 = vst [vmem:[#allocation2 + $0x10] sm:$0x3] (!%p241_p9), %v2447_v36  ;;  %646 = vst [vmem:[#allocation2 + $0x18] sm:$0xff] (!%p241_p9), %v2447_v36  ;;  %v2302_v45 = vpack.c.bf16 (!%p241_p9), %v1679_v44, %v1678_v43  ;;  %v1680_v46 = vld [vmem:[%s3545_s5 + $0x40] sm:$0xff] (!%p241_p9)  ;;  %v1681_v47 = vld [vmem:[%s3545_s5 + $0x48] sm:$0xff] (!%p241_p9)  ;;  %v766_v60 = vsub.s32 (!%p241_p9), 0, %v765_v59  ;;  %s3490_s17 = scalar_lea.hbm (!%p241_p9), %s3547_s7, %s2078_s13 }
  0x12   : > { %2330 = vmatpush3.bf16.msra.mxu1 (!%p241_p9), %v2290_v3  ;;  %649 = vst [vmem:[#allocation2 + $0x30] sm:$0xff] (!%p241_p9), %v2447_v36  ;;  %650 = vst [vmem:[#allocation2 + $0x38] sm:$0xff] (!%p241_p9), %v2447_v36  ;;  %v2306_v48 = vpack.c.bf16 (!%p241_p9), %v1681_v47, %v1680_v46  ;;  %v1682_v49 = vld [vmem:[%s3545_s5 + $0x50] sm:$0xff] (!%p241_p9)  ;;  %v1683_v50 = vld [vmem:[%s3545_s5 + $0x58] sm:$0xff] (!%p241_p9)  ;;  %v834_v61 = vsub.s32 (!%p241_p9), 1, %v765_v59  ;;  %v934_v1 = vsub.s32 (!%p241_p9), 2, %v765_v59 }
  0x13   : > { %651 = vst [vmem:[#allocation2 + $0x40] sm:$0x3] (!%p241_p9), %v2447_v36  ;;  %652 = vst [vmem:[#allocation2 + $0x48] sm:$0xff] (!%p241_p9), %v2447_v36  ;;  %2323 = vmatprep.subr.bf16.mxu1 (!%p241_p9), %v2294_v39  ;;  %v2310_v51 = vpack.c.bf16 (!%p241_p9), %v1683_v50, %v1682_v49  ;;  %v1684_v52 = vld [vmem:[%s3545_s5 + $0x60] sm:$0xff] (!%p241_p9)  ;;  %v1685_v53 = vld [vmem:[%s3545_s5 + $0x68] sm:$0xff] (!%p241_p9) }
  0x14   : > { %653 = vst [vmem:[#allocation2 + $0x50] sm:$0xff] (!%p241_p9), %v2447_v36  ;;  %654 = vst [vmem:[#allocation2 + $0x58] sm:$0x3] (!%p241_p9), %v2447_v36  ;;  %v2314_v54 = vpack.c.bf16 (!%p241_p9), %v1685_v53, %v1684_v52  ;;  %v1686_v55 = vld [vmem:[%s3545_s5 + $0x70] sm:$0xff] (!%p241_p9)  ;;  %v1687_v56 = vld [vmem:[%s3545_s5 + $0x78] sm:$0xff] (!%p241_p9) }
  0x15   : > { %s273_s19 = scalar_select %p272_p10, %s2512_s28, 1  ;;  %655 = vst [vmem:[#allocation2 + $0x60] sm:$0xff] %v2447_v36  ;;  %656 = vst [vmem:[#allocation2 + $0x68] sm:$0xff] %v2447_v36  ;;  %v2318_v57 = vpack.c.bf16 %v1687_v56, %v1686_v55  ;;  %v730_v62 = vld [vmem:[%s3543_s3] sm:$0xff] }
  0x16   : > { %657 = vst [vmem:[#allocation2 + $0x70] sm:$0x3] %v2447_v36  ;;  %658 = vst [vmem:[#allocation2 + $0x78] sm:$0xff] %v2447_v36  ;;  %2331 = vmatpush3.bf16.msra.mxu1 %v2294_v39  ;;  %v2664_v63 = vrot.slane %v730_v62, %v766_v60  ;;  %v2666_v2 = vrot.slane %v730_v62, %v834_v61  ;;  %v2732_v60 = vld [vmem:[%s3543_s3 + $0x8] ss:$0 sm:$0xff]  ;;  %s3499_s28 = scalar_lea.sflag [#allocation4], %s269_s22 }
  0x17   : > { %s2077_s20 = sshll.u32 %s273_s19, 8  ;;  %659 = vst [vmem:[#allocation2 + $0x80] sm:$0xff] %v2447_v36  ;;  %660 = vst [vmem:[#allocation2 + $0x88] sm:$0x3] %v2447_v36  ;;  %2324 = vmatprep.subr.bf16.mxu1 %v2298_v42  ;;  %v800_v0 = vld [vmem:[#allocation2 + $0x1] sm:$0xff]  ;;  %s2448_s19 = smov [#allocation3]  }
  0x18   : > { %s2553_s23 = scalar_lea.vmem %s3540_s0, %s2077_s20  ;;  %661 = vst [vmem:[#allocation2 + $0x90] sm:$0xff] %v2447_v36  ;;  %662 = vst [vmem:[#allocation2 + $0x98] sm:$0xff] %v2447_v36  ;;  %s2387_s20 = sshll.u32 %s2448_s19, 4  ;;  %s2388_s20 = int_to_ptr.vmem [resolvable:$false] %s2387_s20 }
  0x19   : > { %v277_v4 = vld [vmem:[%s2553_s23] sm:$0xff]  ;;  %v278_v5 = vld [vmem:[%s2553_s23 + $0x8] sm:$0xff]  ;;  %v279_v6 = vld [vmem:[%s2553_s23 + $0x10] sm:$0xff]  ;;  %663 = vst [vmem:[#allocation2 + $0xa0] sm:$0x3] %v2447_v36  ;;  %s2389_s21 = scalar_lea.vmem %s2388_s20, 8192 }
  0x1a   : > { %2162 = vmatprep.mubr.msk.f32.mxu0 %vm317_vm1, %v277_v4  ;;  %v280_v7 = vld [vmem:[%s2553_s23 + $0x18] sm:$0xff]  ;;  %v281_v8 = vld [vmem:[%s2553_s23 + $0x20] sm:$0xff]  ;;  %v282_v9 = vld [vmem:[%s2553_s23 + $0x28] sm:$0xff]  ;;  %664 = vst [vmem:[#allocation2 + $0xa8] sm:$0xff] %v2447_v36  ;;  %2332 = vmatpush3.bf16.msra.mxu1 %v2298_v42 }
  0x1b   : > { %2163 = vmatmul.mubr.msk.f32.vlgmr.msra.gmra.mrb[0].mxu0 %vm317_vm1, %v278_v5  ;;  %v283_v10 = vld [vmem:[%s2553_s23 + $0x30] sm:$0xff]  ;;  %v284_v11 = vld [vmem:[%s2553_s23 + $0x38] sm:$0xff]  ;;  %v285_v12 = vld [vmem:[%s2553_s23 + $0x40] sm:$0xff]  ;;  %665 = vst [vmem:[#allocation2 + $0xb0] sm:$0xff] %v2447_v36  ;;  %2325 = vmatprep.subr.bf16.mxu1 %v2302_v45  ;;  %v768_v5 = vmul.f32 0.0, %v2664_v63 }
  0x1c   : > { %2165 = vmatprep.mubr.msk.f32.mxu0 %vm317_vm1, %v279_v6  ;;  %2293 = vmatpush3.bf16.msra.mxu0 %v2290_v3  ;;  %v286_v13 = vld [vmem:[%s2553_s23 + $0x48] sm:$0xff]  ;;  %v287_v14 = vld [vmem:[%s2553_s23 + $0x50] sm:$0xff]  ;;  %v288_v15 = vld [vmem:[%s2553_s23 + $0x58] sm:$0xff]  ;;  %666 = vst [vmem:[#allocation2 + $0xb8] sm:$0x3] %v2447_v36  ;;  %v836_v6 = vmul.f32 %v2666_v2, %v800_v0 }
  0x1d   : > { %v289_v16 = vld [vmem:[%s2553_s23 + $0x60] sm:$0xff]  ;;  %v290_v17 = vld [vmem:[%s2553_s23 + $0x68] sm:$0xff]  ;;  %v291_v18 = vld [vmem:[%s2553_s23 + $0x70] sm:$0xff]  ;;  %667 = vst [vmem:[#allocation2 + $0xc0] sm:$0xff] %v2447_v36  ;;  %2295 = vmatprep.subr.bf16.mxu0 %v2294_v39 }
  0x1e   : > { %v292_v19 = vld [vmem:[%s2553_s23 + $0x78] sm:$0xff]  ;;  %v293_v20 = vld [vmem:[%s2553_s23 + $0x80] sm:$0xff]  ;;  %v294_v21 = vld [vmem:[%s2553_s23 + $0x88] sm:$0xff]  ;;  %668 = vst [vmem:[#allocation2 + $0xc8] sm:$0xff] %v2447_v36  ;;  %2333 = vmatpush3.bf16.msra.mxu1 %v2302_v45 }
  0x1f   : > { %2166 = vmatmul.mubr.msk.f32.gmra.mrb[2].mxu0 %vm317_vm1, %v280_v7  ;;  %v295_v22 = vld [vmem:[%s2553_s23 + $0x90] sm:$0xff]  ;;  %v296_v23 = vld [vmem:[%s2553_s23 + $0x98] sm:$0xff]  ;;  %v297_v24 = vld [vmem:[%s2553_s23 + $0xa0] sm:$0xff]  ;;  %669 = vst [vmem:[#allocation2 + $0xd0] sm:$0x3] %v2447_v36  ;;  %2326 = vmatprep.subr.bf16.mxu1 %v2306_v48 }
  0x20   : > { %2168 = vmatprep.mubr.msk.f32.mxu0 %vm317_vm1, %v281_v8  ;;  %v298_v25 = vld [vmem:[%s2553_s23 + $0xa8] sm:$0xff]  ;;  %v299_v26 = vld [vmem:[%s2553_s23 + $0xb0] sm:$0xff]  ;;  %v300_v27 = vld [vmem:[%s2553_s23 + $0xb8] sm:$0xff]  ;;  %670 = vst [vmem:[#allocation2 + $0xd8] sm:$0xff] %v2447_v36  ;;  %2297 = vmatpush3.bf16.msra.mxu0 %v2294_v39  ;;  %v2675_v8 = vrot.slane %v730_v62, %v934_v1 }
  0x21   : > { %v301_v28 = vld [vmem:[%s2553_s23 + $0xc0] sm:$0xff]  ;;  %v302_v29 = vld [vmem:[%s2553_s23 + $0xc8] sm:$0xff]  ;;  %v303_v30 = vld [vmem:[%s2553_s23 + $0xd0] sm:$0xff]  ;;  %671 = vst [vmem:[#allocation2 + $0xe0] sm:$0xff] %v2447_v36  ;;  %2299 = vmatprep.subr.bf16.mxu0 %v2298_v42 }
  0x22   : > { %v304_v31 = vld [vmem:[%s2553_s23 + $0xd8] sm:$0xff]  ;;  %v305_v32 = vld [vmem:[%s2553_s23 + $0xe0] sm:$0xff]  ;;  %v306_v33 = vld [vmem:[%s2553_s23 + $0xe8] sm:$0xff]  ;;  %672 = vst [vmem:[#allocation2 + $0xe8] sm:$0x3] %v2447_v36  ;;  %2334 = vmatpush3.bf16.msra.mxu1 %v2306_v48 }
  0x23   : > { %2169 = vmatmul.mubr.msk.f32.gmra.mrb[4].mxu0 %vm317_vm1, %v282_v9  ;;  %v307_v34 = vld [vmem:[%s2553_s23 + $0xf0] sm:$0xff]  ;;  %v308_v35 = vld [vmem:[%s2553_s23 + $0xf8] sm:$0xff]  ;;  %673 = vst [vmem:[#allocation2 + $0xf0] sm:$0xff] %v2447_v36  ;;  %674 = vst [vmem:[#allocation2 + $0xf8] sm:$0xff] %v2447_v36  ;;  %2327 = vmatprep.subr.bf16.mxu1 %v2310_v51  ;;  %s2032_s23 = sshll.u32 %s269_s22, 8 }
  0x24   : > { %2171 = vmatprep.mubr.msk.f32.mxu0 %vm317_vm1, %v283_v10  ;;  %675 = vst [vmem:[#allocation2 + $0x100] sm:$0x3] %v2447_v36  ;;  %676 = vst [vmem:[#allocation2 + $0x108] sm:$0xff] %v2447_v36  ;;  %2301 = vmatpush3.bf16.msra.mxu0 %v2298_v42  ;;  %v801_v3 = vld [vmem:[#allocation2 + $0x9] sm:$0xff]  ;;  %v2671_v4 = vld [vmem:[%s3542_s2] ss:$0 sm:$0xff] }
  0x25   : > { %677 = vst [vmem:[#allocation2 + $0x110] sm:$0xff] %v2447_v36  ;;  %678 = vst [vmem:[#allocation2 + $0x118] sm:$0x3] %v2447_v36  ;;  %2303 = vmatprep.subr.bf16.mxu0 %v2302_v45  ;;  %v837_v9 = vmul.f32 %v2666_v2, %v801_v3  ;;  %s3424_s9 = scalar_lea.vmem [#allocation3], %s2032_s23 }
  0x26   : > { %679 = vst [vmem:[#allocation2 + $0x120] sm:$0xff] %v2447_v36  ;;  %680 = vst [vmem:[#allocation2 + $0x128] sm:$0xff] %v2447_v36  ;;  %2335 = vmatpush3.bf16.msra.mxu1 %v2310_v51  ;;  %s1966_s14 = sshll.u32 %s3424_s9, 4  ;;  %s3492_s14 = int_to_ptr.vmem [resolvable:$true] %s1966_s14 }
  0x27   : > { %2172 = vmatmul.mubr.msk.f32.gmra.mrb[6].mxu0 %vm317_vm1, %v284_v11  ;;  %681 = vst [vmem:[#allocation2 + $0x130] sm:$0x3] %v2447_v36  ;;  %682 = vst [vmem:[#allocation2 + $0x138] sm:$0xff] %v2447_v36  ;;  %2328 = vmatprep.subr.bf16.mxu1 %v2314_v54  ;;  %s2383_s18 = scalar_lea.vmem %s3492_s14, 4096  ;;  %p2390_p0 = scmp.lt.s32.totalorder %s3492_s14, %s2388_s20 }
  0x28   : > { %2174 = vmatprep.mubr.msk.f32.mxu0 %vm317_vm1, %v285_v12  ;;  %683 = vst [vmem:[#allocation2 + $0x140] sm:$0xff] %v2447_v36  ;;  %684 = vst [vmem:[#allocation2 + $0x148] sm:$0x3] %v2447_v36  ;;  %2305 = vmatpush3.bf16.msra.mxu0 %v2302_v45  ;;  %v900_v12 = vld [vmem:[#allocation2 + $0x2] sm:$0xff]  ;;  %p2384_p11 = scmp.ne.s32.totalorder %s3492_s14, %s2383_s18  ;;  %p2391_p1 = scmp.lt.s32.totalorder %s2389_s21, %s2383_s18 }
  0x29   : > { %685 = vst [vmem:[#allocation2 + $0x150] sm:$0xff] %v2447_v36  ;;  %686 = vst [vmem:[#allocation2 + $0x158] sm:$0xff] %v2447_v36  ;;  %2307 = vmatprep.subr.bf16.mxu0 %v2306_v48 }
  0x2a   : > { %687 = vst [vmem:[#allocation2 + $0x160] sm:$0x3] %v2447_v36  ;;  %688 = vst [vmem:[#allocation2 + $0x168] sm:$0xff] %v2447_v36  ;;  %2336 = vmatpush3.bf16.msra.mxu1 %v2314_v54  ;;  %p2385_p12 = pnand %p2384_p11, %p2529_p5  ;;  %p2392_p2 = por %p2391_p1, %p2390_p0 }
  0x2b   : > { %2175 = vmatmul.mubr.msk.f32.gmra.mrb[8].mxu0 %vm317_vm1, %v286_v13  ;;  %689 = vst [vmem:[#allocation2 + $0x170] sm:$0xff] %v2447_v36  ;;  %690 = vst [vmem:[#allocation2 + $0x178] sm:$0x3] %v2447_v36  ;;  %2329 = vmatprep.subr.bf16.mxu1 %v2318_v57  ;;  %v1134_v13 = vsub.s32 4, %v765_v59 }
  0x2c   : > { %2177 = vmatprep.mubr.msk.f32.mxu0 %vm317_vm1, %v287_v14  ;;  %691 = vst [vmem:[#allocation2 + $0x180] sm:$0xff] %v2447_v36  ;;  %692 = vst [vmem:[#allocation2 + $0x188] sm:$0xff] %v2447_v36  ;;  %2309 = vmatpush3.bf16.msra.mxu0 %v2306_v48  ;;  %v901_v14 = vld [vmem:[#allocation2 + $0xa] sm:$0xff]  ;;  %p2386_p13 = pneg %p2385_p12 }
  0x2d   : > { %693 = vst [vmem:[#allocation2 + $0x190] sm:$0x3] %v2447_v36  ;;  %694 = vst [vmem:[#allocation2 + $0x198] sm:$0xff] %v2447_v36  ;;  %2311 = vmatprep.subr.bf16.mxu0 %v2310_v51 }
  0x2e   : > { %695 = vst [vmem:[#allocation2 + $0x1a0] sm:$0xff] %v2447_v36  ;;  %696 = vst [vmem:[#allocation2 + $0x1a8] sm:$0x3] %v2447_v36  ;;  %2337 = vmatpush3.bf16.msra.mxu1 %v2318_v57  ;;  %p2393_p3 = pnand %p2392_p2, %p2386_p13 }
  0x2f   : > { %2178 = vmatmul.mubr.msk.f32.gmra.mrb[10].mxu0 %vm317_vm1, %v288_v15 }
  0x30   : > { %2180 = vmatprep.mubr.msk.f32.mxu0 %vm317_vm1, %v289_v16  ;;  %2313 = vmatpush3.bf16.msra.mxu0 %v2310_v51  ;;  %v1435_v16 = vsub.s32 7, %v765_v59 }
  0x31   : > { %2315 = vmatprep.subr.bf16.mxu0 %v2314_v54 }
  0x33   : > { %2181 = vmatmul.mubr.msk.f32.gmra.mrb[12].mxu0 %vm317_vm1, %v290_v17  ;;  %v868_v17 = vadd.f32 %v836_v6, %v768_v5 }
  0x34   : > { %2183 = vmatprep.mubr.msk.f32.mxu0 %vm317_vm1, %v291_v18  ;;  %2317 = vmatpush3.bf16.msra.mxu0 %v2314_v54  ;;  %v1034_v18 = vsub.s32 3, %v765_v59 }
  0x35   : > { %2319 = vmatprep.subr.bf16.mxu0 %v2318_v57 }
  0x37   : > { %2184 = vmatmul.mubr.msk.f32.gmra.mrb[14].mxu0 %vm317_vm1, %v292_v19  ;;  %v1234_v19 = vsub.s32 5, %v765_v59 }
  0x38   : > { %2186 = vmatprep.mubr.msk.f32.mxu0 %vm317_vm1, %v293_v20  ;;  %2321 = vmatpush3.bf16.msra.mxu0 %v2318_v57 }
  0x3b   : > { %2187 = vmatmul.mubr.msk.f32.gmra.mrb[16].mxu0 %vm317_vm1, %v294_v21  ;;  %v936_v21 = vmul.f32 %v2675_v8, %v900_v12 }
  0x3c   : > { %2189 = vmatprep.mubr.msk.f32.mxu0 %vm317_vm1, %v295_v22  ;;  %v1335_v22 = vsub.s32 6, %v765_v59 }
  0x3f   : > { %2190 = vmatmul.mubr.msk.f32.gmra.mrb[18].mxu0 %vm317_vm1, %v296_v23  ;;  %v869_v23 = vadd.f32 %v837_v9, %v768_v5 }
  0x40   : > { %2192 = vmatprep.mubr.msk.f32.mxu0 %vm317_vm1, %v297_v24  ;;  %v937_v24 = vmul.f32 %v2675_v8, %v901_v14 }
  0x43   : > { %2193 = vmatmul.mubr.msk.f32.gmra.mrb[20].mxu0 %vm317_vm1, %v298_v25 }
  0x44   : > { %2195 = vmatprep.mubr.msk.f32.mxu0 %vm317_vm1, %v299_v26 }
  0x47   : > { %2196 = vmatmul.mubr.msk.f32.gmra.mrb[22].mxu0 %vm317_vm1, %v300_v27  ;;  %v2683_v27 = vrot.slane %v730_v62, %v1134_v13 }
  0x48   : > { %2198 = vmatprep.mubr.msk.f32.mxu0 %vm317_vm1, %v301_v28 }
  0x4b   : > { %2199 = vmatmul.mubr.msk.f32.gmra.mrb[24].mxu0 %vm317_vm1, %v302_v29  ;;  %v2686_v29 = vrot.slane %v730_v62, %v1435_v16 }
  0x4c   : > { %2201 = vmatprep.mubr.msk.f32.mxu0 %vm317_vm1, %v303_v30  ;;  %v2688_v30 = vrot.slane %v730_v62, %v1234_v19 }
  0x4f   : > { %2202 = vmatmul.mubr.msk.f32.gmra.mrb[26].mxu0 %vm317_vm1, %v304_v31 }
  0x50   : > { %2204 = vmatprep.mubr.msk.f32.mxu0 %vm317_vm1, %v305_v32  ;;  %v968_v32 = vadd.f32 %v936_v21, %v868_v17 }
  0x53   : > { %2205 = vmatmul.mubr.msk.f32.gmra.mrb[28].mxu0 %vm317_vm1, %v306_v33  ;;  %v2690_v33 = vrot.slane %v730_v62, %v1034_v18 }
  0x54   : > { %2207 = vmatprep.mubr.msk.f32.mxu0 %vm317_vm1, %v307_v34  ;;  %v2692_v34 = vrot.slane %v730_v62, %v1335_v22 }
  0x57   : > { %2208 = vmatmul.mubr.msk.f32.gmra.mrb[30].mxu0 %vm317_vm1, %v308_v35  ;;  %v969_v35 = vadd.f32 %v937_v24, %v869_v23 }
  0xee   : > { %v2164_v7 = vpop.f32.mrb[0].mxu0 }
  0xef   : > { %v490_v10 = vadd.f32 %v2164_v7, %v2671_v4  ;;  %v484_v11 = vpop.f32.mrb[1].mxu0 }
  0xf0   : > { %v485_v15 = vadd.f32 %v2671_v4, %v484_v11 }
  0xf1   : > { %699 = vst [vmem:[#allocation2 + $0x21] sm:$0xff] %v490_v10  ;;  %v1137_v39 = vmul.f32 %v2683_v27, %v490_v10  ;;  %v839_v40 = vmul.f32 %v2666_v2, %v490_v10 }
  0xf2   : > { %698 = vst [vmem:[#allocation2 + $0x19] sm:$0xff] %v485_v15  ;;  %v2167_v20 = vpop.f32.mrb[2].mxu0  ;;  %v1136_v38 = vmul.f32 %v2683_v27, %v485_v15  ;;  %v838_v44 = vmul.f32 %v2666_v2, %v485_v15 }
  0xf3   : > { %v500_v25 = vadd.f32 %v2167_v20, %v2671_v4  ;;  %v494_v26 = vpop.f32.mrb[3].mxu0 }
  0xf4   : > { %v495_v28 = vadd.f32 %v2671_v4, %v494_v26 }
  0xf5   : > { %701 = vst [vmem:[#allocation2 + $0x39] sm:$0xff] %v500_v25  ;;  %v2704_v43 = vmul.f32 %v2686_v29, %v500_v25  ;;  %v2708_v45 = vmul.f32 %v2683_v27, %v500_v25  ;;  %v2719_v51 = vmul.f32 %v2666_v2, %v500_v25 }
  0xf6   : > { %700 = vst [vmem:[#allocation2 + $0x31] sm:$0xff] %v495_v28  ;;  %v2170_v31 = vpop.f32.mrb[4].mxu0  ;;  %v2712_v47 = vmul.f32 %v2686_v29, %v495_v28  ;;  %v1138_v49 = vmul.f32 %v2683_v27, %v495_v28  ;;  %v2716_v50 = vmul.f32 %v2666_v2, %v495_v28 }
  0xf7   : > { %v2695_v36 = vadd.f32 %v2170_v31, %v2671_v4  ;;  %v504_v37 = vpop.f32.mrb[5].mxu0 }
  0xf8   : > { %v2701_v41 = vadd.f32 %v2671_v4, %v504_v37  ;;  %v1201_v42 = vld [vmem:[#allocation2 + $0x22] sm:$0xff] }
  0xf9   : > { %703 = vst [vmem:[#allocation2 + $0x51] sm:$0xff] %v2695_v36  ;;  %v1000_v46 = vld [vmem:[#allocation2 + $0x18] sm:$0xff]  ;;  %v1001_v48 = vld [vmem:[#allocation2 + $0x20] sm:$0xff]  ;;  %v1237_v56 = vmul.f32 %v2688_v30, %v1201_v42  ;;  %v939_v62 = vmul.f32 %v1201_v42, %v2675_v8  ;;  %v2738_v0 = vmul.f32 %v2686_v29, %v2695_v36 }
  0xfa   : > { %702 = vst [vmem:[#allocation2 + $0x49] sm:$0xff] %v2701_v41  ;;  %v2173_v52 = vpop.f32.mrb[6].mxu0  ;;  %v1036_v53 = vmul.f32 %v2690_v33, %v1000_v46  ;;  %v1200_v54 = vld [vmem:[#allocation2 + $0x1a] sm:$0xff]  ;;  %v1037_v55 = vmul.f32 %v2690_v33, %v1001_v48  ;;  %v770_v57 = vmul.f32 %v1000_v46, %v2664_v63  ;;  %v771_v61 = vmul.f32 %v1001_v48, %v2664_v63 }
  0xfb   : > { %v2727_v58 = vadd.f32 %v2173_v52, %v2671_v4  ;;  %v514_v59 = vpop.f32.mrb[7].mxu0  ;;  %v1236_v9 = vmul.f32 %v2688_v30, %v1200_v54  ;;  %v938_v12 = vmul.f32 %v1200_v54, %v2675_v8  ;;  %v2752_v13 = vmul.f32 %v2686_v29, %v2701_v41 }
  0xfc   : > { %v2741_v1 = vadd.f32 %v2671_v4, %v514_v59  ;;  %v1068_v3 = vadd.f32 %v1036_v53, %v968_v32  ;;  %v1069_v5 = vadd.f32 %v1037_v55, %v969_v35  ;;  %v2743_v6 = vld [vmem:[#allocation2 + $0x3a] sm:$0xff]  ;;  %v870_v7 = vadd.f32 %v838_v44, %v770_v57 }
  0xfd   : > { %705 = vst [vmem:[#allocation2 + $0x69] sm:$0xff] %v2727_v58  ;;  %v1301_v10 = vld [vmem:[#allocation2 + $0x30] sm:$0xff]  ;;  %v2747_v11 = vld [vmem:[#allocation2 + $0x38] sm:$0xff]  ;;  %v871_v14 = vadd.f32 %v839_v40, %v771_v61  ;;  %v1538_v18 = vmul.f32 %v2732_v60, %v2743_v6  ;;  %v1239_v19 = vmul.f32 %v2743_v6, %v2688_v30  ;;  %v1140_v40 = vmul.f32 %v2683_v27, %v2701_v41 }
  0xfe   : > { %704 = vst [vmem:[#allocation2 + $0x61] sm:$0xff] %v2741_v1  ;;  %v2176_v15 = vpop.f32.mrb[8].mxu0  ;;  %v1168_v16 = vadd.f32 %v1136_v38, %v1068_v3  ;;  %v1169_v17 = vadd.f32 %v1137_v39, %v1069_v5  ;;  %v1337_v22 = vmul.f32 %v2692_v34, %v1301_v10  ;;  %v1501_v23 = vld [vmem:[#allocation2 + $0x32] sm:$0xff]  ;;  %v970_v24 = vadd.f32 %v938_v12, %v870_v7 }
  0xff   : > { %v2760_v20 = vadd.f32 %v2176_v15, %v2671_v4  ;;  %v524_v21 = vpop.f32.mrb[9].mxu0  ;;  %v1038_v25 = vmul.f32 %v1301_v10, %v2690_v33  ;;  %v1338_v32 = vmul.f32 %v2692_v34, %v2747_v11  ;;  %v971_v38 = vadd.f32 %v939_v62, %v871_v14 }
 0x100   : > { %v2765_v26 = vadd.f32 %v2671_v4, %v524_v21  ;;  %v1268_v28 = vadd.f32 %v1236_v9, %v1168_v16  ;;  %v1269_v31 = vadd.f32 %v1237_v56, %v1169_v17  ;;  %v2769_v35 = vld [vmem:[#allocation2 + $0x52] sm:$0xff]  ;;  %v1039_v39 = vmul.f32 %v2747_v11, %v2690_v33 }
 0x101   : > { %707 = vst [vmem:[#allocation2 + $0x81] sm:$0xff] %v2760_v20  ;;  %v1070_v37 = vadd.f32 %v1038_v25, %v970_v24  ;;  %v1537_v46 = vmul.f32 %v2732_v60, %v1501_v23  ;;  %v1238_v52 = vmul.f32 %v1501_v23, %v2688_v30  ;;  %v2779_v53 = vld [vmem:[#allocation2 + $0x48] sm:$0xff]  ;;  %v1540_v59 = vmul.f32 %v2732_v60, %v2769_v35  ;;  %v2791_v5 = vld [vmem:[#allocation2 + $0x50] sm:$0xff] }
 0x102   : > { %706 = vst [vmem:[#allocation2 + $0x79] sm:$0xff] %v2765_v26  ;;  %v2179_v42 = vpop.f32.mrb[10].mxu0  ;;  %v1369_v44 = vadd.f32 %v1337_v22, %v1268_v28  ;;  %v1370_v48 = vadd.f32 %v1338_v32, %v1269_v31  ;;  %v1071_v57 = vadd.f32 %v1039_v39, %v971_v38  ;;  %v772_v7 = vmul.f32 %v1301_v10, %v2664_v63  ;;  %v1503_v16 = vld [vmem:[#allocation2 + $0x4a] sm:$0xff] }
 0x103   : > { %v2782_v54 = vadd.f32 %v2179_v42, %v2671_v4  ;;  %v534_v55 = vpop.f32.mrb[11].mxu0  ;;  %v1170_v56 = vadd.f32 %v1138_v49, %v1070_v37  ;;  %v2798_v49 = vld [vmem:[%s3544_s4] ss:$0 sm:$0xff]  ;;  %v1339_v12 = vmul.f32 %v2692_v34, %v2779_v53  ;;  %v1040_v21 = vmul.f32 %v2779_v53, %v2690_v33 }
 0x104   : > { %v2787_v61 = vadd.f32 %v2671_v4, %v534_v55  ;;  %v1469_v62 = vadd.f32 %v2712_v47, %v1369_v44  ;;  %v1470_v3 = vadd.f32 %v2704_v43, %v1370_v48  ;;  %v1171_v14 = vadd.f32 %v2708_v45, %v1071_v57 }
 0x105   : > { %709 = vst [vmem:[#allocation2 + $0x99] sm:$0xff] %v2782_v54  ;;  %v1270_v9 = vadd.f32 %v1238_v52, %v1170_v56  ;;  %v940_v47 = vmul.f32 %v1501_v23, %v2675_v8  ;;  %v872_v17 = vadd.f32 %v2716_v50, %v772_v7  ;;  %v1340_v45 = vmul.f32 %v2692_v34, %v2791_v5  ;;  %v2829_v57 = vld [vmem:[#allocation2 + $0x60] sm:$0xff] }
 0x106   : > { %708 = vst [vmem:[#allocation2 + $0x91] sm:$0xff] %v2787_v61  ;;  %v2182_v43 = vpop.f32.mrb[12].mxu0  ;;  %v1569_v15 = vadd.f32 %v1537_v46, %v1469_v62  ;;  %v1570_v10 = vadd.f32 %v1538_v18, %v1470_v3  ;;  %v1271_v28 = vadd.f32 %v1239_v19, %v1171_v14  ;;  %v1539_v37 = vmul.f32 %v2732_v60, %v1503_v16 }
 0x107   : > { %v2809_v22 = vadd.f32 %v2182_v43, %v2671_v4  ;;  %v544_v24 = vpop.f32.mrb[13].mxu0  ;;  %v1371_v25 = vadd.f32 %v1339_v12, %v1270_v9  ;;  %v972_v50 = vadd.f32 %v940_v47, %v872_v17  ;;  %v1240_v19 = vmul.f32 %v1503_v16, %v2688_v30  ;;  %v2848_v43 = vld [vmem:[#allocation2 + $0x62] sm:$0xff] }
 0x108   : > { %v2814_v23 = vadd.f32 %v2671_v4, %v544_v24  ;;  %v1608_v18 = vadd.f32 %v2798_v49, %v1569_v15  ;;  %v1609_v31 = vadd.f32 %v2798_v49, %v1570_v10  ;;  %v1372_v38 = vadd.f32 %v1340_v45, %v1271_v28 }
 0x109   : > { %711 = vst [vmem:[#allocation2 + $0xb1] sm:$0xff] %v2809_v22  ;;  %v1471_v32 = vadd.f32 %v2752_v13, %v1371_v25  ;;  %v1072_v46 = vadd.f32 %v1040_v21, %v972_v50  ;;  %v773_v48 = vmul.f32 %v2747_v11, %v2664_v63  ;;  %v941_v62 = vmul.f32 %v2743_v6, %v2675_v8 }
 0x10a   : > { %710 = vst [vmem:[#allocation2 + $0xa9] sm:$0xff] %v2814_v23  ;;  %v2185_v39 = vpop.f32.mrb[14].mxu0  ;;  %v1640_v42 = vmax.f32 %v1608_v18, 0.0  ;;  %v1641_v44 = vmax.f32 %v1609_v31, 0.0  ;;  %v1472_v13 = vadd.f32 %v2738_v0, %v1372_v38  ;;  %v1041_v11 = vmul.f32 %v2791_v5, %v2690_v33  ;;  %v2859_v18 = vld [vmem:[#allocation2 + $0x68] sm:$0xff] }
 0x10b   : > { %v2826_v52 = vadd.f32 %v2185_v39, %v2671_v4  ;;  %v554_v55 = vpop.f32.mrb[15].mxu0  ;;  %v1571_v56 = vadd.f32 %v1539_v37, %v1471_v32  ;;  %v1172_v7 = vadd.f32 %v1140_v40, %v1072_v46  ;;  %v873_v9 = vadd.f32 %v2719_v51, %v773_v48 }
 0x10c   : > { %v2834_v3 = vadd.f32 %v2671_v4, %v554_v55  ;;  %2242 = vmatprep.mubr.f32.mxu0 %v1640_v42  ;;  %v1572_v12 = vadd.f32 %v1540_v59, %v1472_v13  ;;  %v1141_v14 = vmul.f32 %v2683_v27, %v2695_v36  ;;  %v1341_v40 = vmul.f32 %v2692_v34, %v2829_v57  ;;  %v2870_v42 = vld [vmem:[#allocation2 + $0x6a] sm:$0xff] }
 0x10d   : > { %713 = vst [vmem:[#allocation2 + $0xc9] sm:$0xff] %v2826_v52  ;;  %2243 = vmatmul.mubr.f32.vlgmr.msra.gmra.mrb[32].mxu0 %v1641_v44  ;;  %v1610_v0 = vadd.f32 %v2798_v49, %v1571_v56  ;;  %v1272_v47 = vadd.f32 %v1240_v19, %v1172_v7  ;;  %v1441_v51 = vmul.f32 %v2686_v29, %v2741_v1 }
 0x10e   : > { %712 = vst [vmem:[#allocation2 + $0xc1] sm:$0xff] %v2834_v3  ;;  %v2188_v6 = vpop.f32.mrb[16].mxu0  ;;  %v973_v15 = vadd.f32 %v941_v62, %v873_v9  ;;  %v1611_v21 = vadd.f32 %v2798_v49, %v1572_v12  ;;  %v774_v24 = vmul.f32 %v2779_v53, %v2664_v63  ;;  %v842_v31 = vmul.f32 %v2666_v2, %v2701_v41 }
 0x10f   : > { %v2851_v10 = vadd.f32 %v2188_v6, %v2671_v4  ;;  %v564_v59 = vpop.f32.mrb[17].mxu0  ;;  %v1642_v17 = vmax.f32 %v1610_v0, 0.0  ;;  %v1373_v28 = vadd.f32 %v1341_v40, %v1272_v47  ;;  %v1541_v32 = vmul.f32 %v2732_v60, %v2848_v43 }
 0x110   : > { %v2857_v25 = vadd.f32 %v2671_v4, %v564_v59  ;;  %v1073_v45 = vadd.f32 %v1041_v11, %v973_v15  ;;  %v1643_v50 = vmax.f32 %v1611_v21, 0.0  ;;  %v1241_v53 = vmul.f32 %v2769_v35, %v2688_v30  ;;  %v2897_v15 = vld [vmem:[#allocation2 + $0x78] sm:$0xff] }
 0x111   : > { %715 = vst [vmem:[#allocation2 + $0xe1] sm:$0xff] %v2851_v10  ;;  %2245 = vmatprep.mubr.f32.mxu0 %v1642_v17  ;;  %v942_v37 = vmul.f32 %v1503_v16, %v2675_v8  ;;  %v1473_v19 = vadd.f32 %v1441_v51, %v1373_v28  ;;  %v874_v41 = vadd.f32 %v842_v31, %v774_v24 }
 0x112   : > { %714 = vst [vmem:[#allocation2 + $0xd9] sm:$0xff] %v2857_v25  ;;  %v2191_v38 = vpop.f32.mrb[18].mxu0  ;;  %v1173_v39 = vadd.f32 %v1141_v14, %v1073_v45  ;;  %v1042_v44 = vmul.f32 %v2829_v57, %v2690_v33  ;;  %2246 = vmatmul.mubr.f32.gmra.mrb[34].mxu0 %v1643_v50  ;;  %v1342_v55 = vmul.f32 %v2692_v34, %v2859_v18 }
 0x113   : > { %v2875_v46 = vadd.f32 %v2191_v38, %v2671_v4  ;;  %v574_v48 = vpop.f32.mrb[19].mxu0  ;;  %v1442_v16 = vmul.f32 %v2686_v29, %v2727_v58  ;;  %v1573_v13 = vadd.f32 %v1541_v32, %v1473_v19  ;;  %v974_v7 = vadd.f32 %v942_v37, %v874_v41  ;;  %v2917_v19 = vld [vmem:[#allocation2 + $0x7a] sm:$0xff] }
 0x114   : > { %v2882_v56 = vadd.f32 %v2671_v4, %v574_v48  ;;  %v1273_v62 = vadd.f32 %v1241_v53, %v1173_v39  ;;  %v1542_v9 = vmul.f32 %v2732_v60, %v2870_v42  ;;  %v1142_v11 = vmul.f32 %v2683_v27, %v2741_v1 }
 0x115   : > { %717 = vst [vmem:[#allocation2 + $0xf9] sm:$0xff] %v2875_v46  ;;  %v775_v0 = vmul.f32 %v2791_v5, %v2664_v63  ;;  %v843_v12 = vmul.f32 %v2666_v2, %v2695_v36  ;;  %v1612_v14 = vadd.f32 %v2798_v49, %v1573_v13  ;;  %v1074_v40 = vadd.f32 %v1042_v44, %v974_v7 }
 0x116   : > { %716 = vst [vmem:[#allocation2 + $0xf1] sm:$0xff] %v2882_v56  ;;  %v1374_v6 = vadd.f32 %v1342_v55, %v1273_v62  ;;  %v2194_v47 = vpop.f32.mrb[20].mxu0  ;;  %v1242_v51 = vmul.f32 %v2848_v43, %v2688_v30  ;;  %v943_v36 = vmul.f32 %v2769_v35, %v2675_v8  ;;  %v1043_v21 = vmul.f32 %v2859_v18, %v2690_v33  ;;  %v2923_v55 = vld [vmem:[#allocation2 + $0x80] sm:$0xff] }
 0x117   : > { %v2900_v59 = vadd.f32 %v2194_v47, %v2671_v4  ;;  %v584_v17 = vpop.f32.mrb[21].mxu0  ;;  %v875_v5 = vadd.f32 %v843_v12, %v775_v0  ;;  %v1644_v24 = vmax.f32 %v1612_v14, 0.0  ;;  %v1174_v31 = vadd.f32 %v1142_v11, %v1074_v40 }
 0x118   : > { %v1474_v28 = vadd.f32 %v1442_v16, %v1374_v6  ;;  %v2907_v45 = vadd.f32 %v2671_v4, %v584_v17  ;;  %v1343_v50 = vmul.f32 %v2692_v34, %v2897_v15  ;;  %v1443_v32 = vmul.f32 %v2686_v29, %v2765_v26  ;;  %v2940_v6 = vld [vmem:[#allocation2 + $0x82] sm:$0xff] }
 0x119   : > { %719 = vst [vmem:[#allocation2 + $0x111] sm:$0xff] %v2900_v59  ;;  %v975_v53 = vadd.f32 %v943_v36, %v875_v5  ;;  %v776_v35 = vmul.f32 %v2829_v57, %v2664_v63  ;;  %2248 = vmatprep.mubr.f32.mxu0 %v1644_v24  ;;  %v1274_v38 = vadd.f32 %v1242_v51, %v1174_v31 }
 0x11a   : > { %v1574_v37 = vadd.f32 %v1542_v9, %v1474_v28  ;;  %718 = vst [vmem:[#allocation2 + $0x109] sm:$0xff] %v2907_v45  ;;  %v1143_v39 = vmul.f32 %v2683_v27, %v2727_v58  ;;  %v2197_v41 = vpop.f32.mrb[22].mxu0  ;;  %v844_v44 = vmul.f32 %v2666_v2, %v2741_v1  ;;  %v944_v13 = vmul.f32 %v2848_v43, %v2675_v8 }
 0x11b   : > { %v1075_v48 = vadd.f32 %v1043_v21, %v975_v53  ;;  %v2926_v16 = vadd.f32 %v2197_v41, %v2671_v4  ;;  %v594_v57 = vpop.f32.mrb[23].mxu0  ;;  %v1044_v62 = vmul.f32 %v2897_v15, %v2690_v33  ;;  %v1375_v9 = vadd.f32 %v1343_v50, %v1274_v38  ;;  %v2948_v21 = vld [vmem:[#allocation2 + $0x90] sm:$0xff] }
 0x11c   : > { %v1613_v7 = vadd.f32 %v2798_v49, %v1574_v37  ;;  %v2934_v11 = vadd.f32 %v2671_v4, %v594_v57  ;;  %v876_v1 = vadd.f32 %v844_v44, %v776_v35  ;;  %v1543_v0 = vmul.f32 %v2732_v60, %v2917_v19 }
 0x11d   : > { %v1175_v12 = vadd.f32 %v1143_v39, %v1075_v48  ;;  %v1243_v14 = vmul.f32 %v2870_v42, %v2688_v30  ;;  %721 = vst [vmem:[#allocation2 + $0x129] sm:$0xff] %v2926_v16  ;;  %v1475_v47 = vadd.f32 %v1443_v32, %v1375_v9  ;;  %v1344_v40 = vmul.f32 %v2692_v34, %v2923_v55 }
 0x11e   : > { %v1645_v43 = vmax.f32 %v1613_v7, 0.0  ;;  %720 = vst [vmem:[#allocation2 + $0x121] sm:$0xff] %v2934_v11  ;;  %v976_v51 = vadd.f32 %v944_v13, %v876_v1  ;;  %v2200_v17 = vpop.f32.mrb[24].mxu0  ;;  %v1444_v36 = vmul.f32 %v2686_v29, %v2760_v20  ;;  %v777_v24 = vmul.f32 %v2859_v18, %v2664_v63 }
 0x11f   : > { %v1275_v5 = vadd.f32 %v1243_v14, %v1175_v12  ;;  %v845_v28 = vmul.f32 %v2666_v2, %v2727_v58  ;;  %v604_v31 = vpop.f32.mrb[25].mxu0  ;;  %v1575_v50 = vadd.f32 %v1543_v0, %v1475_v47  ;;  %v1544_v32 = vmul.f32 %v2732_v60, %v2940_v6  ;;  %v2973_v12 = vld [vmem:[#allocation2 + $0x92] sm:$0xff] }
 0x120   : > { %2249 = vmatmul.mubr.f32.gmra.mrb[36].mxu0 %v1645_v43  ;;  %v1076_v53 = vadd.f32 %v1044_v62, %v976_v51  ;;  %v1144_v35 = vmul.f32 %v2683_v27, %v2765_v26  ;;  %v945_v39 = vmul.f32 %v2870_v42, %v2675_v8  ;;  %v1045_v18 = vmul.f32 %v2923_v55, %v2690_v33 }
 0x121   : > { %v1376_v37 = vadd.f32 %v1344_v40, %v1275_v5  ;;  %v877_v38 = vadd.f32 %v845_v28, %v777_v24  ;;  %v1614_v58 = vadd.f32 %v2798_v49, %v1575_v50  ;;  %v1244_v44 = vmul.f32 %v2917_v19, %v2688_v30  ;;  %v2983_v5 = vld [vmem:[#allocation2 + $0x98] sm:$0xff] }
 0x122   : > { %v1176_v41 = vadd.f32 %v1144_v35, %v1076_v53  ;;  %v1345_v48 = vmul.f32 %v2692_v34, %v2948_v21  ;;  %v2203_v57 = vpop.f32.mrb[26].mxu0  ;;  %v2968_v7 = vadd.f32 %v2200_v17, %v2671_v4  ;;  %v2971_v42 = vadd.f32 %v2671_v4, %v604_v31  ;;  %v2998_v35 = vld [vmem:[#allocation2 + $0x9a] sm:$0xff] }
 0x123   : > { %v1476_v13 = vadd.f32 %v1444_v36, %v1376_v37  ;;  %v977_v62 = vadd.f32 %v945_v39, %v877_v38  ;;  %v614_v9 = vpop.f32.mrb[27].mxu0  ;;  %v1646_v1 = vmax.f32 %v1614_v58, 0.0  ;;  %v778_v14 = vmul.f32 %v2897_v15, %v2664_v63 }
 0x124   : > { %v1276_v0 = vadd.f32 %v1244_v44, %v1176_v41  ;;  %v846_v43 = vmul.f32 %v2666_v2, %v2765_v26  ;;  %v1445_v40 = vmul.f32 %v2686_v29, %v2787_v61  ;;  %v1145_v17 = vmul.f32 %v2683_v27, %v2760_v20  ;;  %723 = vst [vmem:[#allocation2 + $0x141] sm:$0xff] %v2968_v7 }
 0x125   : > { %v1576_v47 = vadd.f32 %v1544_v32, %v1476_v13  ;;  %v1077_v51 = vadd.f32 %v1045_v18, %v977_v62  ;;  %722 = vst [vmem:[#allocation2 + $0x139] sm:$0xff] %v2971_v42  ;;  %2251 = vmatprep.mubr.f32.mxu1 %v1646_v1  ;;  %v946_v26 = vmul.f32 %v2917_v19, %v2675_v8 }
 0x126   : > { %v1377_v36 = vadd.f32 %v1345_v48, %v1276_v0  ;;  %v878_v15 = vadd.f32 %v846_v43, %v778_v14  ;;  %v1046_v24 = vmul.f32 %v2948_v21, %v2690_v33  ;;  %v2991_v28 = vpop.f32.mrb[28].mxu0  ;;  %v1545_v50 = vmul.f32 %v2732_v60, %v2973_v12  ;;  %v3008_v48 = vld [vmem:[#allocation2 + $0xa8] sm:$0xff] }
 0x127   : > { %v1615_v31 = vadd.f32 %v2798_v49, %v1576_v47  ;;  %v1177_v32 = vadd.f32 %v1145_v17, %v1077_v51  ;;  %v1245_v53 = vmul.f32 %v2940_v6, %v2688_v30  ;;  %v3000_v37 = vpop.f32.mrb[29].mxu0  ;;  %v1346_v19 = vmul.f32 %v2692_v34, %v2983_v5 }
 0x128   : > { %v1477_v38 = vadd.f32 %v1445_v40, %v1377_v36  ;;  %v978_v39 = vadd.f32 %v946_v26, %v878_v15  ;;  %v779_v18 = vmul.f32 %v2923_v55, %v2664_v63  ;;  %v1446_v44 = vmul.f32 %v2686_v29, %v2782_v54 }
 0x129   : > { %v1647_v58 = vmax.f32 %v1615_v31, 0.0  ;;  %v1277_v41 = vadd.f32 %v1245_v53, %v1177_v32  ;;  %v847_v13 = vmul.f32 %v2666_v2, %v2760_v20  ;;  %v1546_v1 = vmul.f32 %v2732_v60, %v2998_v35 }
 0x12a   : > { %v1577_v62 = vadd.f32 %v1545_v50, %v1477_v38  ;;  %v1078_v0 = vadd.f32 %v1046_v24, %v978_v39  ;;  %v1146_v14 = vmul.f32 %v2683_v27, %v2787_v61  ;;  %v3016_v43 = vpop.f32.mrb[30].mxu0  ;;  %v947_v40 = vmul.f32 %v2940_v6, %v2675_v8  ;;  %v1511_v38 = vld [vmem:[#allocation2 + $0xaa] sm:$0xff] }
 0x12b   : > { %2252 = vmatmul.mubr.f32.vlgmr.msra.gmra.mrb[0].mxu1 %v1647_v58  ;;  %v1378_v55 = vadd.f32 %v1346_v19, %v1277_v41  ;;  %v879_v47 = vadd.f32 %v847_v13, %v779_v18  ;;  %v1047_v51 = vmul.f32 %v2983_v5, %v2690_v33  ;;  %v3022_v20 = vpop.f32.mrb[31].mxu0  ;;  %v1246_v15 = vmul.f32 %v2973_v12, %v2688_v30 }
 0x12c   : > { %v1616_v17 = vadd.f32 %v2798_v49, %v1577_v62  ;;  %v1178_v36 = vadd.f32 %v1146_v14, %v1078_v0  ;;  %v1347_v26 = vmul.f32 %v2692_v34, %v3008_v48  ;;  %v3030_v50 = vadd.f32 %v2203_v57, %v2671_v4 }
 0x12d   : > { %v1478_v24 = vadd.f32 %v1446_v44, %v1378_v55  ;;  %v979_v31 = vadd.f32 %v947_v40, %v879_v47  ;;  %v3033_v6 = vadd.f32 %v2671_v4, %v614_v9  ;;  %v780_v19 = vmul.f32 %v2948_v21, %v2664_v63  ;;  %v3043_v44 = vld [vmem:[#allocation2 + $0xb0] sm:$0xff] }
 0x12e   : > { %v1648_v32 = vmax.f32 %v1616_v17, 0.0  ;;  %v1278_v53 = vadd.f32 %v1246_v15, %v1178_v36  ;;  %v848_v39 = vmul.f32 %v2666_v2, %v2787_v61  ;;  %v1447_v58 = vmul.f32 %v2686_v29, %v2814_v23  ;;  %725 = vst [vmem:[#allocation2 + $0x159] sm:$0xff] %v3030_v50  ;;  %v3055_v55 = vld [vmem:[#allocation2 + $0xb2] sm:$0xff] }
 0x12f   : > { %v1578_v18 = vadd.f32 %v1546_v1, %v1478_v24  ;;  %v1079_v41 = vadd.f32 %v1047_v51, %v979_v31  ;;  %v1147_v57 = vmul.f32 %v2683_v27, %v2782_v54  ;;  %724 = vst [vmem:[#allocation2 + $0x151] sm:$0xff] %v3033_v6  ;;  %v948_v61 = vmul.f32 %v2973_v12, %v2675_v8 }
 0x130   : > { %2254 = vmatprep.mubr.f32.mxu1 %v1648_v32  ;;  %v1379_v9 = vadd.f32 %v1347_v26, %v1278_v53  ;;  %v880_v21 = vadd.f32 %v848_v39, %v780_v19  ;;  %v1048_v13 = vmul.f32 %v3008_v48, %v2690_v33  ;;  %v1547_v1 = vmul.f32 %v2732_v60, %v1511_v38  ;;  %v3063_v26 = vld [vmem:[#allocation2 + $0xc0] sm:$0xff] }
 0x131   : > { %v1617_v62 = vadd.f32 %v2798_v49, %v1578_v18  ;;  %v1179_v0 = vadd.f32 %v1147_v57, %v1079_v41  ;;  %v1247_v14 = vmul.f32 %v2998_v35, %v2688_v30  ;;  %v1348_v40 = vmul.f32 %v2692_v34, %v3043_v44 }
 0x132   : > { %v1479_v47 = vadd.f32 %v1447_v58, %v1379_v9  ;;  %v980_v51 = vadd.f32 %v948_v61, %v880_v21  ;;  %v781_v12 = vmul.f32 %v2983_v5, %v2664_v63  ;;  %v1448_v15 = vmul.f32 %v2686_v29, %v2809_v22 }
 0x133   : > { %v1649_v17 = vmax.f32 %v1617_v62, 0.0  ;;  %v1279_v36 = vadd.f32 %v1247_v14, %v1179_v0  ;;  %v849_v24 = vmul.f32 %v2666_v2, %v2782_v54  ;;  %v1548_v32 = vmul.f32 %v2732_v60, %v3055_v55  ;;  %v3087_v0 = vld [vmem:[#allocation2 + $0xc2] sm:$0xff] }
 0x134   : > { %v1579_v31 = vadd.f32 %v1547_v1, %v1479_v47  ;;  %v1080_v53 = vadd.f32 %v1048_v13, %v980_v51  ;;  %v1148_v19 = vmul.f32 %v2683_v27, %v2814_v23  ;;  %v949_v18 = vmul.f32 %v2998_v35, %v2675_v8 }
 0x135   : > { %2255 = vmatmul.mubr.f32.gmra.mrb[2].mxu1 %v1649_v17  ;;  %v1380_v5 = vadd.f32 %v1348_v40, %v1279_v36  ;;  %v881_v39 = vadd.f32 %v849_v24, %v781_v12  ;;  %v1049_v58 = vmul.f32 %v3043_v44, %v2690_v33  ;;  %v1248_v57 = vmul.f32 %v1511_v38, %v2688_v30 }
 0x136   : > { %v1618_v41 = vadd.f32 %v2798_v49, %v1579_v31  ;;  %v1180_v54 = vadd.f32 %v1148_v19, %v1080_v53  ;;  %v1349_v9 = vmul.f32 %v2692_v34, %v3063_v26  ;;  %v3081_v13 = vadd.f32 %v2991_v28, %v2671_v4  ;;  %v3109_v53 = vld [vmem:[#allocation2 + $0xca] sm:$0xff] }
 0x137   : > { %v1480_v21 = vadd.f32 %v1448_v15, %v1380_v5  ;;  %v981_v61 = vadd.f32 %v949_v18, %v881_v39  ;;  %v3085_v35 = vadd.f32 %v2671_v4, %v3000_v37  ;;  %v782_v14 = vmul.f32 %v3008_v48, %v2664_v63  ;;  %v3097_v37 = vld [vmem:[#allocation2 + $0xc8] sm:$0xff]  ;;  %v815_v15 = vld [vmem:[#allocation2 + $0xb1] sm:$0xff] }
 0x138   : > { %v1650_v62 = vmax.f32 %v1618_v41, 0.0  ;;  %v1280_v1 = vadd.f32 %v1248_v57, %v1180_v54  ;;  %v850_v47 = vmul.f32 %v2666_v2, %v2814_v23  ;;  %v1449_v51 = vmul.f32 %v2686_v29, %v2834_v3  ;;  %727 = vst [vmem:[#allocation2 + $0x171] sm:$0xff] %v3081_v13  ;;  %v3117_v54 = vld [vmem:[#allocation2 + $0xd8] sm:$0xff] }
 0x139   : > { %v1580_v40 = vadd.f32 %v1548_v32, %v1480_v21  ;;  %v1081_v28 = vadd.f32 %v1049_v58, %v981_v61  ;;  %v1149_v12 = vmul.f32 %v2683_v27, %v2809_v22  ;;  %726 = vst [vmem:[#allocation2 + $0x169] sm:$0xff] %v3085_v35  ;;  %v950_v36 = vmul.f32 %v1511_v38, %v2675_v8 }
 0x13a   : > { %2257 = vmatprep.mubr.f32.mxu1 %v1650_v62  ;;  %v1381_v17 = vadd.f32 %v1349_v9, %v1280_v1  ;;  %v882_v48 = vadd.f32 %v850_v47, %v782_v14  ;;  %v1050_v23 = vmul.f32 %v3063_v26, %v2690_v33  ;;  %v1549_v22 = vmul.f32 %v2732_v60, %v3087_v0  ;;  %v816_v47 = vld [vmem:[#allocation2 + $0xc1] sm:$0xff] }
 0x13b   : > { %v1619_v24 = vadd.f32 %v2798_v49, %v1580_v40  ;;  %v1181_v31 = vadd.f32 %v1149_v12, %v1081_v28  ;;  %v1249_v32 = vmul.f32 %v3055_v55, %v2688_v30  ;;  %v1350_v5 = vmul.f32 %v2692_v34, %v3097_v37 }
 0x13c   : > { %v1481_v19 = vadd.f32 %v1449_v51, %v1381_v17  ;;  %v982_v38 = vadd.f32 %v950_v36, %v882_v48  ;;  %v783_v39 = vmul.f32 %v3043_v44, %v2664_v63  ;;  %v1450_v41 = vmul.f32 %v2686_v29, %v2826_v52 }
 0x13d   : > { %v1651_v18 = vmax.f32 %v1619_v24, 0.0  ;;  %v1281_v58 = vadd.f32 %v1249_v32, %v1181_v31  ;;  %v851_v57 = vmul.f32 %v2666_v2, %v815_v15  ;;  %v1550_v21 = vmul.f32 %v2732_v60, %v3109_v53  ;;  %v1515_v24 = vld [vmem:[#allocation2 + $0xda] sm:$0xff] }
 0x13e   : > { %v1581_v9 = vadd.f32 %v1549_v22, %v1481_v19  ;;  %v1082_v61 = vadd.f32 %v1050_v23, %v982_v38  ;;  %v1150_v62 = vmul.f32 %v2683_v27, %v2834_v3  ;;  %v951_v14 = vmul.f32 %v3055_v55, %v2675_v8  ;;  %v1115_v3 = vld [vmem:[#allocation2 + $0xc9] sm:$0xff]  ;;  %v3147_v38 = vld [vmem:[#allocation2 + $0xe0] sm:$0xff] }
 0x13f   : > { %2258 = vmatmul.mubr.f32.gmra.mrb[4].mxu1 %v1651_v18  ;;  %v1382_v1 = vadd.f32 %v1350_v5, %v1281_v58  ;;  %v883_v44 = vadd.f32 %v851_v57, %v783_v39  ;;  %v1051_v52 = vmul.f32 %v3097_v37, %v2690_v33  ;;  %v1250_v28 = vmul.f32 %v3087_v0, %v2688_v30 }
 0x140   : > { %v1620_v40 = vadd.f32 %v2798_v49, %v1581_v9  ;;  %v1182_v51 = vadd.f32 %v1150_v62, %v1082_v61  ;;  %v1351_v12 = vmul.f32 %v2692_v34, %v3117_v54  ;;  %v3135_v36 = vadd.f32 %v3016_v43, %v2671_v4  ;;  %v1516_v9 = vld [vmem:[#allocation2 + $0xe2] sm:$0xff] }
 0x141   : > { %v1482_v17 = vadd.f32 %v1450_v41, %v1382_v1  ;;  %v983_v48 = vadd.f32 %v951_v14, %v883_v44  ;;  %v3139_v55 = vadd.f32 %v2671_v4, %v3022_v20  ;;  %v784_v22 = vmul.f32 %v3063_v26, %v2664_v63 }
 0x142   : > { %v1652_v23 = vmax.f32 %v1620_v40, 0.0  ;;  %v1282_v15 = vadd.f32 %v1250_v28, %v1182_v51  ;;  %v852_v31 = vmul.f32 %v2666_v2, %v816_v47  ;;  %v1451_v19 = vmul.f32 %v2686_v29, %v2857_v25  ;;  %729 = vst [vmem:[#allocation2 + $0x189] sm:$0xff] %v3135_v36 }
 0x143   : > { %v1582_v32 = vadd.f32 %v1550_v21, %v1482_v17  ;;  %v1083_v5 = vadd.f32 %v1051_v52, %v983_v48  ;;  %v1151_v43 = vmul.f32 %v2683_v27, %v1115_v3  ;;  %728 = vst [vmem:[#allocation2 + $0x181] sm:$0xff] %v3139_v55  ;;  %v952_v26 = vmul.f32 %v3087_v0, %v2675_v8  ;;  %v1317_v52 = vld [vmem:[#allocation2 + $0xf0] sm:$0xff]  ;;  %v818_v17 = vld [vmem:[#allocation2 + $0xd9] sm:$0xff] }
 0x144   : > { %2260 = vmatprep.mubr.f32.mxu1 %v1652_v23  ;;  %v1383_v4 = vadd.f32 %v1351_v12, %v1282_v15  ;;  %v884_v20 = vadd.f32 %v852_v31, %v784_v22  ;;  %v1052_v39 = vmul.f32 %v3117_v54, %v2690_v33  ;;  %v1551_v58 = vmul.f32 %v2732_v60, %v1515_v24 }
 0x145   : > { %v1621_v18 = vadd.f32 %v2798_v49, %v1582_v32  ;;  %v1183_v41 = vadd.f32 %v1151_v43, %v1083_v5  ;;  %v1251_v57 = vmul.f32 %v3109_v53, %v2688_v30  ;;  %v1352_v61 = vmul.f32 %v2692_v34, %v3147_v38  ;;  %v1517_v5 = vld [vmem:[#allocation2 + $0xf2] sm:$0xff] }
 0x146   : > { %v1483_v21 = vadd.f32 %v1451_v19, %v1383_v4  ;;  %v984_v62 = vadd.f32 %v952_v26, %v884_v20  ;;  %v785_v0 = vmul.f32 %v3097_v37, %v2664_v63  ;;  %v1452_v14 = vmul.f32 %v2686_v29, %v2851_v10 }
 0x147   : > { %v1653_v1 = vmax.f32 %v1621_v18, 0.0  ;;  %v1283_v44 = vadd.f32 %v1251_v57, %v1183_v41  ;;  %v853_v47 = vmul.f32 %v1115_v3, %v2666_v2  ;;  %v1552_v51 = vmul.f32 %v2732_v60, %v1516_v9 }
 0x148   : > { %v1583_v40 = vadd.f32 %v1551_v58, %v1483_v21  ;;  %v1084_v28 = vadd.f32 %v1052_v39, %v984_v62  ;;  %v1152_v12 = vmul.f32 %v2683_v27, %v2857_v25  ;;  %v953_v37 = vmul.f32 %v3109_v53, %v2675_v8  ;;  %v3181_v39 = vld [vmem:[#allocation2 + $0xf8] sm:$0xff] }
 0x149   : > { %2261 = vmatmul.mubr.f32.gmra.mrb[6].mxu1 %v1653_v1  ;;  %v1384_v48 = vadd.f32 %v1352_v61, %v1283_v44  ;;  %v885_v23 = vadd.f32 %v853_v47, %v785_v0  ;;  %v1053_v15 = vmul.f32 %v3147_v38, %v2690_v33  ;;  %v1252_v31 = vmul.f32 %v1515_v24, %v2688_v30  ;;  %v819_v61 = vld [vmem:[#allocation2 + $0xe1] sm:$0xff] }
 0x14a   : > { %v1622_v22 = vadd.f32 %v2798_v49, %v1583_v40  ;;  %v1184_v3 = vadd.f32 %v1152_v12, %v1084_v28  ;;  %v1353_v32 = vmul.f32 %v2692_v34, %v1317_v52  ;;  %v786_v43 = vmul.f32 %v3117_v54, %v2664_v63 }
 0x14b   : > { %v1484_v19 = vadd.f32 %v1452_v14, %v1384_v48  ;;  %v985_v25 = vadd.f32 %v953_v37, %v885_v23  ;;  %v854_v4 = vmul.f32 %v2666_v2, %v818_v17  ;;  %v1153_v26 = vmul.f32 %v2683_v27, %v2851_v10 }
 0x14c   : > { %v1654_v20 = vmax.f32 %v1622_v22, 0.0  ;;  %v1284_v53 = vadd.f32 %v1252_v31, %v1184_v3  ;;  %v954_v18 = vmul.f32 %v1515_v24, %v2675_v8  ;;  %v1054_v21 = vmul.f32 %v1317_v52, %v2690_v33 }
 0x14d   : > { %v1584_v58 = vadd.f32 %v1552_v51, %v1484_v19  ;;  %v1085_v41 = vadd.f32 %v1053_v15, %v985_v25  ;;  %v886_v57 = vadd.f32 %v854_v4, %v786_v43  ;;  %v1453_v54 = vmul.f32 %v2686_v29, %v2882_v56  ;;  %v1518_v51 = vld [vmem:[#allocation2 + $0xfa] sm:$0xff]  ;;  %v1319_v15 = vld [vmem:[#allocation2 + $0x108] sm:$0xff] }
 0x14e   : > { %2263 = vmatprep.mubr.f32.mxu1 %v1654_v20  ;;  %v1385_v62 = vadd.f32 %v1353_v32, %v1284_v53  ;;  %v1553_v0 = vmul.f32 %v2732_v60, %v1517_v5  ;;  %v1253_v1 = vmul.f32 %v1516_v9, %v2688_v30  ;;  %v1354_v24 = vmul.f32 %v2692_v34, %v3181_v39 }
 0x14f   : > { %v1623_v10 = vadd.f32 %v2798_v49, %v1584_v58  ;;  %v1185_v44 = vadd.f32 %v1153_v26, %v1085_v41  ;;  %v986_v14 = vadd.f32 %v954_v18, %v886_v57  ;;  %v1454_v40 = vmul.f32 %v2686_v29, %v2875_v46  ;;  %v1519_v41 = vld [vmem:[#allocation2 + $0x10a] sm:$0xff] }
 0x150   : > { %v1485_v47 = vadd.f32 %v1453_v54, %v1385_v62  ;;  %v787_v28 = vmul.f32 %v3147_v38, %v2664_v63  ;;  %v855_v12 = vmul.f32 %v2666_v2, %v819_v61  ;;  %v1154_v37 = vmul.f32 %v2683_v27, %v2882_v56  ;;  %v3209_v57 = vld [vmem:[#allocation2 + $0x110] sm:$0xff] }
 0x151   : > { %v1655_v17 = vmax.f32 %v1623_v10, 0.0  ;;  %v1285_v48 = vadd.f32 %v1253_v1, %v1185_v44  ;;  %v1086_v23 = vadd.f32 %v1054_v21, %v986_v14  ;;  %v955_v31 = vmul.f32 %v1516_v9, %v2675_v8  ;;  %v3216_v10 = vld [vmem:[#allocation2 + $0x112] sm:$0xff] }
 0x152   : > { %v1585_v22 = vadd.f32 %v1553_v0, %v1485_v47  ;;  %v887_v3 = vadd.f32 %v855_v12, %v787_v28  ;;  %v1055_v32 = vmul.f32 %v3181_v39, %v2690_v33  ;;  %v1554_v38 = vmul.f32 %v2732_v60, %v1518_v51  ;;  %v821_v14 = vld [vmem:[#allocation2 + $0xf9] sm:$0xff] }
 0x153   : > { %2264 = vmatmul.mubr.f32.gmra.mrb[8].mxu1 %v1655_v17  ;;  %v1386_v19 = vadd.f32 %v1354_v24, %v1285_v48  ;;  %v1186_v25 = vadd.f32 %v1154_v37, %v1086_v23  ;;  %v1254_v43 = vmul.f32 %v1517_v5, %v2688_v30  ;;  %v1355_v20 = vmul.f32 %v2692_v34, %v1319_v15 }
 0x154   : > { %v1624_v4 = vadd.f32 %v2798_v49, %v1585_v22  ;;  %v987_v53 = vadd.f32 %v955_v31, %v887_v3  ;;  %v788_v26 = vmul.f32 %v1317_v52, %v2664_v63  ;;  %v1455_v9 = vmul.f32 %v2686_v29, %v2907_v45  ;;  %v1321_v22 = vld [vmem:[#allocation2 + $0x120] sm:$0xff] }
 0x155   : > { %v1486_v18 = vadd.f32 %v1454_v40, %v1386_v19  ;;  %v1286_v58 = vadd.f32 %v1254_v43, %v1186_v25  ;;  %v856_v21 = vmul.f32 %v2666_v2, %v2882_v56  ;;  %v1155_v54 = vmul.f32 %v2683_v27, %v2875_v46 }
 0x156   : > { %v1656_v61 = vmax.f32 %v1624_v4, 0.0  ;;  %v1087_v62 = vadd.f32 %v1055_v32, %v987_v53  ;;  %v956_v0 = vmul.f32 %v1517_v5, %v2675_v8  ;;  %v1056_v24 = vmul.f32 %v1319_v15, %v2690_v33 }
 0x157   : > { %v1586_v1 = vadd.f32 %v1554_v38, %v1486_v18  ;;  %v1387_v52 = vadd.f32 %v1355_v20, %v1286_v58  ;;  %v888_v44 = vadd.f32 %v856_v21, %v788_v26  ;;  %v1555_v47 = vmul.f32 %v2732_v60, %v1519_v41  ;;  %v1521_v58 = vld [vmem:[#allocation2 + $0x122] sm:$0xff] }
 0x158   : > { %2266 = vmatprep.mubr.f32.mxu1 %v1656_v61  ;;  %v1187_v40 = vadd.f32 %v1155_v54, %v1087_v62  ;;  %v1255_v56 = vmul.f32 %v1518_v51, %v2688_v30  ;;  %v1356_v28 = vmul.f32 %v2692_v34, %v3209_v57  ;;  %v789_v17 = vmul.f32 %v3181_v39, %v2664_v63 }
 0x159   : > { %v1625_v46 = vadd.f32 %v2798_v49, %v1586_v1  ;;  %v1487_v5 = vadd.f32 %v1455_v9, %v1387_v52  ;;  %v988_v12 = vadd.f32 %v956_v0, %v888_v44  ;;  %v1456_v23 = vmul.f32 %v2686_v29, %v2900_v59  ;;  %v3244_v0 = vld [vmem:[#allocation2 + $0x128] sm:$0xff] }
 0x15a   : > { %v1287_v48 = vadd.f32 %v1255_v56, %v1187_v40  ;;  %v1556_v37 = vmul.f32 %v2732_v60, %v3216_v10  ;;  %v857_v3 = vmul.f32 %v2666_v2, %v821_v14  ;;  %v1156_v38 = vmul.f32 %v2683_v27, %v2907_v45  ;;  %v3253_v40 = vld [vmem:[%s3543_s3 + $0x8] ss:$0 sm:$0xff] }
 0x15b   : > { %v1657_v31 = vmax.f32 %v1625_v46, 0.0  ;;  %v1587_v32 = vadd.f32 %v1555_v47, %v1487_v5  ;;  %v1088_v19 = vadd.f32 %v1056_v24, %v988_v12  ;;  %v957_v39 = vmul.f32 %v1518_v51, %v2675_v8  ;;  %v823_v47 = vld [vmem:[#allocation2 + $0x111] sm:$0xff] }
 0x15c   : > { %v1388_v25 = vadd.f32 %v1356_v28, %v1287_v48  ;;  %v889_v43 = vadd.f32 %v857_v3, %v789_v17  ;;  %v1057_v4 = vmul.f32 %v3209_v57, %v2690_v33  ;;  %v1256_v53 = vmul.f32 %v1519_v41, %v2688_v30  ;;  %v1522_v48 = vld [vmem:[#allocation2 + $0x12a] sm:$0xff] }
 0x15d   : > { %2267 = vmatmul.mubr.f32.gmra.mrb[10].mxu1 %v1657_v31  ;;  %v1626_v20 = vadd.f32 %v2798_v49, %v1587_v32  ;;  %v1188_v60 = vadd.f32 %v1156_v38, %v1088_v19  ;;  %v1357_v26 = vmul.f32 %v2692_v34, %v1321_v22  ;;  %v790_v21 = vmul.f32 %v1319_v15, %v2664_v63  ;;  %v1323_v38 = vld [vmem:[#allocation2 + $0x138] sm:$0xff] }
 0x15e   : > { %v1488_v18 = vadd.f32 %v1456_v23, %v1388_v25  ;;  %v989_v9 = vadd.f32 %v957_v39, %v889_v43  ;;  %v858_v61 = vmul.f32 %v2666_v2, %v2907_v45  ;;  %v1157_v54 = vmul.f32 %v2683_v27, %v2900_v59 }
 0x15f   : > { %v1658_v51 = vmax.f32 %v1626_v20, 0.0  ;;  %v1288_v62 = vadd.f32 %v1256_v53, %v1188_v60  ;;  %v958_v1 = vmul.f32 %v1519_v41, %v2675_v8  ;;  %v1058_v14 = vmul.f32 %v1321_v22, %v2690_v33 }
 0x160   : > { %v1588_v52 = vadd.f32 %v1556_v37, %v1488_v18  ;;  %v1089_v44 = vadd.f32 %v1057_v4, %v989_v9  ;;  %v890_v24 = vadd.f32 %v858_v61, %v790_v21  ;;  %v1457_v45 = vmul.f32 %v2686_v29, %v2934_v11 }
 0x161   : > { %2269 = vmatprep.mubr.f32.mxu1 %v1658_v51  ;;  %v1389_v15 = vadd.f32 %v1357_v26, %v1288_v62  ;;  %v1557_v59 = vmul.f32 %v3253_v40, %v1521_v58  ;;  %v1257_v41 = vmul.f32 %v3216_v10, %v2688_v30  ;;  %v1358_v46 = vmul.f32 %v2692_v34, %v3244_v0  ;;  %v1523_v62 = vld [vmem:[#allocation2 + $0x13a] sm:$0xff] }
 0x162   : > { %v1627_v56 = vadd.f32 %v2798_v49, %v1588_v52  ;;  %v1189_v28 = vadd.f32 %v1157_v54, %v1089_v44  ;;  %v990_v5 = vadd.f32 %v958_v1, %v890_v24  ;;  %v1458_v17 = vmul.f32 %v2686_v29, %v2926_v16  ;;  %v3279_v54 = vld [vmem:[#allocation2 + $0x140] sm:$0xff] }
 0x163   : > { %v1489_v12 = vadd.f32 %v1457_v45, %v1389_v15  ;;  %v791_v23 = vmul.f32 %v3209_v57, %v2664_v63  ;;  %v859_v37 = vmul.f32 %v2666_v2, %v823_v47  ;;  %v1158_v19 = vmul.f32 %v2683_v27, %v2934_v11  ;;  %v3286_v47 = vld [vmem:[#allocation2 + $0x142] sm:$0xff] }
 0x164   : > { %v1659_v3 = vmax.f32 %v1627_v56, 0.0  ;;  %v1289_v31 = vadd.f32 %v1257_v41, %v1189_v28  ;;  %v1090_v32 = vadd.f32 %v1058_v14, %v990_v5  ;;  %v959_v39 = vmul.f32 %v3216_v10, %v2675_v8 }
 0x165   : > { %v1589_v25 = vadd.f32 %v1557_v59, %v1489_v12  ;;  %v891_v43 = vadd.f32 %v859_v37, %v791_v23  ;;  %v1059_v4 = vmul.f32 %v3244_v0, %v2690_v33  ;;  %v1558_v57 = vmul.f32 %v3253_v40, %v1522_v48  ;;  %v825_v59 = vld [vmem:[#allocation2 + $0x129] sm:$0xff] }
 0x166   : > { %2270 = vmatmul.mubr.f32.gmra.mrb[12].mxu1 %v1659_v3  ;;  %v1390_v20 = vadd.f32 %v1358_v46, %v1289_v31  ;;  %v1190_v60 = vadd.f32 %v1158_v19, %v1090_v32  ;;  %v1258_v53 = vmul.f32 %v1521_v58, %v2688_v30  ;;  %v1359_v18 = vmul.f32 %v2692_v34, %v1323_v38  ;;  %v1325_v3 = vld [vmem:[#allocation2 + $0x150] sm:$0xff] }
 0x167   : > { %v1628_v26 = vadd.f32 %v2798_v49, %v1589_v25  ;;  %v991_v9 = vadd.f32 %v959_v39, %v891_v43  ;;  %v792_v21 = vmul.f32 %v1321_v22, %v2664_v63  ;;  %v1459_v10 = vmul.f32 %v2686_v29, %v2971_v42 }
 0x168   : > { %v1490_v61 = vadd.f32 %v1458_v17, %v1390_v20  ;;  %v1290_v51 = vadd.f32 %v1258_v53, %v1190_v60  ;;  %v860_v1 = vmul.f32 %v2666_v2, %v2934_v11  ;;  %v1159_v49 = vmul.f32 %v2683_v27, %v2926_v16  ;;  %v3296_v16 = vld [vmem:[%s3544_s4] ss:$0 sm:$0xff] }
 0x169   : > { %v1660_v52 = vmax.f32 %v1628_v26, 0.0  ;;  %v1091_v44 = vadd.f32 %v1059_v4, %v991_v9  ;;  %v960_v24 = vmul.f32 %v1521_v58, %v2675_v8  ;;  %v1060_v45 = vmul.f32 %v1323_v38, %v2690_v33  ;;  %v1525_v9 = vld [vmem:[#allocation2 + $0x152] sm:$0xff] }
 0x16a   : > { %v1590_v14 = vadd.f32 %v1558_v57, %v1490_v61  ;;  %v1391_v22 = vadd.f32 %v1359_v18, %v1290_v51  ;;  %v892_v15 = vadd.f32 %v860_v1, %v792_v21  ;;  %v1559_v41 = vmul.f32 %v3253_v40, %v1523_v62 }
 0x16b   : > { %2272 = vmatprep.mubr.f32.mxu1 %v1660_v52  ;;  %v1191_v56 = vadd.f32 %v1159_v49, %v1091_v44  ;;  %v1259_v11 = vmul.f32 %v1522_v48, %v2688_v30  ;;  %v1360_v28 = vmul.f32 %v2692_v34, %v3279_v54  ;;  %v793_v12 = vmul.f32 %v3244_v0, %v2664_v63  ;;  %v1326_v52 = vld [vmem:[#allocation2 + $0x158] sm:$0xff] }
 0x16c   : > { %v1629_v58 = vadd.f32 %v3296_v16, %v1590_v14  ;;  %v1491_v46 = vadd.f32 %v1459_v10, %v1391_v22  ;;  %v992_v5 = vadd.f32 %v960_v24, %v892_v15  ;;  %v1460_v23 = vmul.f32 %v2686_v29, %v2968_v7  ;;  %v827_v15 = vld [vmem:[#allocation2 + $0x141] sm:$0xff] }
 0x16d   : > { %v1291_v17 = vadd.f32 %v1259_v11, %v1191_v56  ;;  %v1560_v37 = vmul.f32 %v3253_v40, %v3286_v47  ;;  %v861_v31 = vmul.f32 %v2666_v2, %v825_v59  ;;  %v1160_v43 = vmul.f32 %v2683_v27, %v2971_v42 }
 0x16e   : > { %v1661_v32 = vmax.f32 %v1629_v58, 0.0  ;;  %v1591_v19 = vadd.f32 %v1559_v41, %v1491_v46  ;;  %v1092_v25 = vadd.f32 %v1060_v45, %v992_v5  ;;  %v961_v0 = vmul.f32 %v1522_v48, %v2675_v8  ;;  %v1526_v58 = vld [vmem:[#allocation2 + $0x15a] sm:$0xff] }
 0x16f   : > { %v1392_v39 = vadd.f32 %v1360_v28, %v1291_v17  ;;  %v893_v4 = vadd.f32 %v861_v31, %v793_v12  ;;  %v1061_v20 = vmul.f32 %v3279_v54, %v2690_v33  ;;  %v1260_v53 = vmul.f32 %v1523_v62, %v2688_v30  ;;  %v1327_v31 = vld [vmem:[#allocation2 + $0x168] sm:$0xff] }
 0x170   : > { %2273 = vmatmul.mubr.f32.gmra.mrb[14].mxu1 %v1661_v32  ;;  %v1630_v57 = vadd.f32 %v3296_v16, %v1591_v19  ;;  %v1192_v60 = vadd.f32 %v1160_v43, %v1092_v25  ;;  %v1361_v26 = vmul.f32 %v2692_v34, %v1325_v3  ;;  %v794_v61 = vmul.f32 %v1323_v38, %v2664_v63 }
 0x171   : > { %v1492_v18 = vadd.f32 %v1460_v23, %v1392_v39  ;;  %v993_v21 = vadd.f32 %v961_v0, %v893_v4  ;;  %v862_v51 = vmul.f32 %v2666_v2, %v2971_v42  ;;  %v1161_v1 = vmul.f32 %v2683_v27, %v2968_v7 }
 0x172   : > { %v1662_v48 = vmax.f32 %v1630_v57, 0.0  ;;  %v1292_v10 = vadd.f32 %v1260_v53, %v1192_v60  ;;  %v962_v44 = vmul.f32 %v1523_v62, %v2675_v8  ;;  %v1062_v22 = vmul.f32 %v1325_v3, %v2690_v33 }
 0x173   : > { %v1592_v49 = vadd.f32 %v1560_v37, %v1492_v18  ;;  %v1093_v24 = vadd.f32 %v1061_v20, %v993_v21  ;;  %v894_v14 = vadd.f32 %v862_v51, %v794_v61  ;;  %v1461_v38 = vmul.f32 %v2686_v29, %v3033_v6  ;;  %v1527_v21 = vld [vmem:[#allocation2 + $0x16a] sm:$0xff] }
 0x174   : > { %2275 = vmatprep.mubr.f32.mxu1 %v1662_v48  ;;  %v1393_v45 = vadd.f32 %v1361_v26, %v1292_v10  ;;  %v1561_v42 = vmul.f32 %v3253_v40, %v1525_v9  ;;  %v1261_v59 = vmul.f32 %v3286_v47, %v2688_v30  ;;  %v1362_v62 = vmul.f32 %v2692_v34, %v1326_v52  ;;  %v3345_v61 = vld [vmem:[#allocation2 + $0x170] sm:$0xff] }
 0x175   : > { %v1631_v7 = vadd.f32 %v3296_v16, %v1592_v49  ;;  %v1193_v41 = vadd.f32 %v1161_v1, %v1093_v24  ;;  %v994_v56 = vadd.f32 %v962_v44, %v894_v14  ;;  %v1462_v28 = vmul.f32 %v2686_v29, %v3030_v50  ;;  %v3352_v24 = vld [vmem:[#allocation2 + $0x172] sm:$0xff] }
 0x176   : > { %v1493_v11 = vadd.f32 %v1461_v38, %v1393_v45  ;;  %v795_v46 = vmul.f32 %v3279_v54, %v2664_v63  ;;  %v863_v5 = vmul.f32 %v2666_v2, %v827_v15  ;;  %v1162_v37 = vmul.f32 %v2683_v27, %v3033_v6 }
 0x177   : > { %v1663_v12 = vmax.f32 %v1631_v7, 0.0  ;;  %v1293_v17 = vadd.f32 %v1261_v59, %v1193_v41  ;;  %v1094_v23 = vadd.f32 %v1062_v22, %v994_v56  ;;  %v963_v25 = vmul.f32 %v3286_v47, %v2675_v8 }
 0x178   : > { %v1593_v32 = vadd.f32 %v1561_v42, %v1493_v11  ;;  %v895_v19 = vadd.f32 %v863_v5, %v795_v46  ;;  %v1063_v43 = vmul.f32 %v1326_v52, %v2690_v33  ;;  %v1562_v54 = vmul.f32 %v3253_v40, %v1526_v58  ;;  %v1329_v11 = vld [vmem:[#allocation2 + $0x180] sm:$0xff] }
 0x179   : > { %2276 = vmatmul.mubr.f32.gmra.mrb[16].mxu1 %v1663_v12  ;;  %v1394_v39 = vadd.f32 %v1362_v62, %v1293_v17  ;;  %v1194_v4 = vadd.f32 %v1162_v37, %v1094_v23  ;;  %v1262_v0 = vmul.f32 %v1525_v9, %v2688_v30  ;;  %v1363_v57 = vmul.f32 %v2692_v34, %v1327_v31 }
 0x17a   : > { %v1632_v20 = vadd.f32 %v3296_v16, %v1593_v32  ;;  %v995_v60 = vadd.f32 %v963_v25, %v895_v19  ;;  %v796_v53 = vmul.f32 %v1325_v3, %v2664_v63  ;;  %v1463_v47 = vmul.f32 %v2686_v29, %v3085_v35 }
 0x17b   : > { %v1494_v26 = vadd.f32 %v1462_v28, %v1394_v39  ;;  %v1294_v18 = vadd.f32 %v1262_v0, %v1194_v4  ;;  %v864_v51 = vmul.f32 %v2666_v2, %v3033_v6  ;;  %v1163_v1 = vmul.f32 %v2683_v27, %v3030_v50 }
 0x17c   : > { %v1664_v48 = vmax.f32 %v1632_v20, 0.0  ;;  %v1095_v10 = vadd.f32 %v1063_v43, %v995_v60  ;;  %v964_v44 = vmul.f32 %v1525_v9, %v2675_v8  ;;  %v1064_v22 = vmul.f32 %v1327_v31, %v2690_v33 }
 0x17d   : > { %v1594_v49 = vadd.f32 %v1562_v54, %v1494_v26  ;;  %v1395_v3 = vadd.f32 %v1363_v57, %v1294_v18  ;;  %v896_v14 = vadd.f32 %v864_v51, %v796_v53  ;;  %v1563_v15 = vmul.f32 %v3253_v40, %v1527_v21  ;;  %v1529_v54 = vld [vmem:[#allocation2 + $0x182] sm:$0xff] }
 0x17e   : > { %2278 = vmatprep.mubr.f32.mxu1 %v1664_v48  ;;  %v1195_v45 = vadd.f32 %v1163_v1, %v1095_v10  ;;  %v1263_v6 = vmul.f32 %v1526_v58, %v2688_v30  ;;  %v1364_v38 = vmul.f32 %v2692_v34, %v3345_v61  ;;  %v797_v7 = vmul.f32 %v1326_v52, %v2664_v63  ;;  %v1330_v53 = vld [vmem:[#allocation2 + $0x188] sm:$0xff] }
 0x17f   : > { %v1633_v42 = vadd.f32 %v3296_v16, %v1594_v49  ;;  %v1495_v59 = vadd.f32 %v1463_v47, %v1395_v3  ;;  %v996_v9 = vadd.f32 %v964_v44, %v896_v14  ;;  %v1464_v62 = vmul.f32 %v2686_v29, %v3081_v13 }
 0x180   : > { %v1295_v41 = vadd.f32 %v1263_v6, %v1195_v45  ;;  %v1564_v56 = vmul.f32 %v3253_v40, %v3352_v24  ;;  %v865_v28 = vmul.f32 %v2666_v2, %v3030_v50  ;;  %v1164_v17 = vmul.f32 %v2683_v27, %v3085_v35 }
 0x181   : > { %v1665_v46 = vmax.f32 %v1633_v42, 0.0  ;;  %v1595_v5 = vadd.f32 %v1563_v15, %v1495_v59  ;;  %v1096_v12 = vadd.f32 %v1064_v22, %v996_v9  ;;  %v965_v52 = vmul.f32 %v1526_v58, %v2675_v8 }
 0x182   : > { %v1396_v23 = vadd.f32 %v1364_v38, %v1295_v41  ;;  %v897_v37 = vadd.f32 %v865_v28, %v797_v7  ;;  %v1065_v32 = vmul.f32 %v3345_v61, %v2690_v33  ;;  %v1264_v43 = vmul.f32 %v1527_v21, %v2688_v30  ;;  %v1530_v7 = vld [vmem:[#allocation2 + $0x18a] sm:$0xff]  ;;  %v1431_v41 = vld [vmem:[#allocation2 + $0x199] sm:$0xff] }
 0x183   : > { %2279 = vmatmul.mubr.f32.gmra.mrb[18].mxu1 %v1665_v46  ;;  %v1634_v19 = vadd.f32 %v3296_v16, %v1595_v5  ;;  %v1196_v25 = vadd.f32 %v1164_v17, %v1096_v12  ;;  %v1365_v50 = vmul.f32 %v2692_v34, %v1329_v11  ;;  %v798_v0 = vmul.f32 %v1327_v31, %v2664_v63 }
 0x184   : > { %v1496_v39 = vadd.f32 %v1464_v62, %v1396_v23  ;;  %v997_v4 = vadd.f32 %v965_v52, %v897_v37  ;;  %v866_v20 = vmul.f32 %v2666_v2, %v3085_v35  ;;  %v1165_v60 = vmul.f32 %v2683_v27, %v3081_v13 }
 0x185   : > { %v1666_v58 = vmax.f32 %v1634_v19, 0.0  ;;  %v1296_v57 = vadd.f32 %v1264_v43, %v1196_v25  ;;  %v966_v26 = vmul.f32 %v1527_v21, %v2675_v8  ;;  %v1066_v48 = vmul.f32 %v1329_v11, %v2690_v33 }
 0x186   : > { %v1596_v18 = vadd.f32 %v1564_v56, %v1496_v39  ;;  %v1097_v47 = vadd.f32 %v1065_v32, %v997_v4  ;;  %v898_v51 = vadd.f32 %v866_v20, %v798_v0  ;;  %v1465_v31 = vmul.f32 %v2686_v29, %v3139_v55 }
 0x187   : > { %2281 = vmatprep.mubr.f32.mxu1 %v1666_v58  ;;  %v1397_v10 = vadd.f32 %v1365_v50, %v1296_v57  ;;  %v1565_v35 = vmul.f32 %v3253_v40, %v1529_v54  ;;  %v1265_v1 = vmul.f32 %v3352_v24, %v2688_v30  ;;  %v1366_v21 = vmul.f32 %v2692_v34, %v1330_v53 }
 0x188   : > { %v1635_v44 = vadd.f32 %v3296_v16, %v1596_v18  ;;  %v1197_v49 = vadd.f32 %v1165_v60, %v1097_v47  ;;  %v998_v3 = vadd.f32 %v966_v26, %v898_v51  ;;  %v1466_v22 = vmul.f32 %v2686_v29, %v3135_v36 }
 0x189   : > { %v1497_v14 = vadd.f32 %v1465_v31, %v1397_v10  ;;  %v799_v15 = vmul.f32 %v3345_v61, %v2664_v63  ;;  %v867_v45 = vmul.f32 %v2666_v2, %v3081_v13  ;;  %v1166_v59 = vmul.f32 %v2683_v27, %v3139_v55  ;;  %v2382_v13 = vld [vmem:[#allocation2] sm:$0xff] }
 0x18a   : > { %v1667_v6 = vmax.f32 %v1635_v44, 0.0  ;;  %v1297_v38 = vadd.f32 %v1265_v1, %v1197_v49  ;;  %v1098_v42 = vadd.f32 %v1066_v48, %v998_v3  ;;  %v967_v56 = vmul.f32 %v3352_v24, %v2675_v8  ;;  %v1531_v55 = vld [vmem:[#allocation2 + $0x19a] sm:$0xff] }
 0x18b   : > { %v1597_v9 = vadd.f32 %v1565_v35, %v1497_v14  ;;  %v899_v62 = vadd.f32 %v867_v45, %v799_v15  ;;  %v1067_v11 = vmul.f32 %v1330_v53, %v2690_v33  ;;  %v1266_v2 = vmul.f32 %v1529_v54, %v2688_v30  ;;  %v1532_v54 = vld [vmem:[#allocation2 + $0x1a2] sm:$0xff] }
 0x18c   : > { %2282 = vmatmul.mubr.f32.gmra.mrb[20].mxu1 %v1667_v6  ;;  %v1398_v63 = vadd.f32 %v1366_v21, %v1297_v38  ;;  %v1198_v61 = vadd.f32 %v1166_v59, %v1098_v42  ;;  %v1367_v28 = vmul.f32 %v2382_v13, %v2692_v34  ;;  %v1566_v17 = vmul.f32 %v3253_v40, %v1530_v7  ;;  %v1432_v34 = vld [vmem:[#allocation2 + $0x1a1] sm:$0xff] }
 0x18d   : > { %v1636_v46 = vadd.f32 %v3296_v16, %v1597_v9  ;;  %v999_v5 = vadd.f32 %v967_v56, %v899_v62  ;;  %v1467_v8 = vmul.f32 %v2686_v29, %v1431_v41  ;;  %v1167_v37 = vmul.f32 %v2683_v27, %v3135_v36 }
 0x18e   : > { %v1498_v12 = vadd.f32 %v1466_v22, %v1398_v63  ;;  %v1298_v23 = vadd.f32 %v1266_v2, %v1198_v61  ;;  %v1567_v19 = vmul.f32 %v3253_v40, %v1531_v55  ;;  %v1267_v43 = vmul.f32 %v1530_v7, %v2688_v30 }
 0x18f   : > { %v1668_v24 = vmax.f32 %v1636_v46, 0.0  ;;  %v1099_v33 = vadd.f32 %v1067_v11, %v999_v5  ;;  %v1468_v0 = vmul.f32 %v2686_v29, %v1432_v34  ;;  %v1568_v58 = vmul.f32 %v3253_v40, %v1532_v54  ;;  %v3420_v29 = vld [vmem:[%s3546_s6] ss:$0 sm:$0xff] }
 0x190   : > { %v1598_v52 = vadd.f32 %v1566_v17, %v1498_v12  ;;  %v1399_v32 = vadd.f32 %v1367_v28, %v1298_v23 }
 0x191   : > { %2284 = vmatprep.mubr.f32.mxu1 %v1668_v24  ;;  %v1199_v25 = vadd.f32 %v1167_v37, %v1099_v33 }
 0x192   : > { %v1637_v50 = vadd.f32 %v3296_v16, %v1598_v52  ;;  %v1499_v39 = vadd.f32 %v1467_v8, %v1399_v32 }
 0x193   : > { %v1299_v4 = vadd.f32 %v1267_v43, %v1199_v25 }
 0x194   : > { %v1669_v20 = vmax.f32 %v1637_v50, 0.0  ;;  %v1599_v27 = vadd.f32 %v1567_v19, %v1499_v39 }
 0x195   : > { %v1400_v36 = vadd.f32 %v1367_v28, %v1299_v4 }
 0x196   : > { %2285 = vmatmul.mubr.f32.gmra.mrb[22].mxu1 %v1669_v20  ;;  %v1638_v57 = vadd.f32 %v3296_v16, %v1599_v27 }
 0x197   : > { %v1500_v60 = vadd.f32 %v1468_v0, %v1400_v36 }
 0x198   : > { %v1670_v53 = vmax.f32 %v1638_v57, 0.0 }
 0x199   : > { %v1600_v30 = vadd.f32 %v1568_v58, %v1500_v60 }
 0x19a   : > { %2287 = vmatprep.mubr.f32.mxu1 %v1670_v53 }
 0x19b   : > { %v1639_v26 = vadd.f32 %v3296_v16, %v1600_v30 }
 0x19d   : > { %v1671_v18 = vmax.f32 %v1639_v26, 0.0 }
 0x19f   : > { %2288 = vmatmul.mubr.f32.gmra.mrb[24].mxu1 %v1671_v18 }
 0x1e0   : > { %v2244_v40 = vpop.f32.mrb[32].mxu0 }
 0x1e1   : > { %v1767_v47 = vadd.f32 %v2244_v40, %v3420_v29  ;;  %v1761_v51 = vpop.f32.mrb[33].mxu0 }
 0x1e2   : > { %v1762_v48 = vadd.f32 %v3420_v29, %v1761_v51 }
 0x1e3   : > { %1921 = vst [vmem:[%s3424_s9 + $0x8] sm:$0xff] %v1767_v47 }
 0x1e4   : > { %1920 = vst [vmem:[%s3424_s9] sm:$0xff] %v1762_v48 }
 0x1e5   : > { %v2247_v16 = vpop.f32.mrb[34].mxu0 }
 0x1e6   : > { %v1777_v10 = vadd.f32 %v2247_v16, %v3420_v29  ;;  %v1771_v31 = vpop.f32.mrb[35].mxu0 }
 0x1e7   : > { %v1772_v35 = vadd.f32 %v3420_v29, %v1771_v31 }
 0x1e8   : > { %1923 = vst [vmem:[%s3424_s9 + $0x18] sm:$0xff] %v1777_v10 }
 0x1e9   : > { %1922 = vst [vmem:[%s3424_s9 + $0x10] sm:$0xff] %v1772_v35 }
 0x1f3   : > { %v2250_v1 = vpop.f32.mrb[36].mxu0 }
 0x1f4   : > { %v1787_v44 = vadd.f32 %v2250_v1, %v3420_v29  ;;  %v1781_v49 = vpop.f32.mrb[37].mxu0 }
 0x1f5   : > { %v1782_v21 = vadd.f32 %v3420_v29, %v1781_v49 }
 0x1f6   : > { %1925 = vst [vmem:[%s3424_s9 + $0x28] sm:$0xff] %v1787_v44 }
 0x1f7   : > { %1924 = vst [vmem:[%s3424_s9 + $0x20] sm:$0xff] %v1782_v21 }
 0x1fe   : > { %v2253_v3 = vpop.f32.mrb[0].mxu1 }
 0x1ff   : > { %v1797_v14 = vadd.f32 %v2253_v3, %v3420_v29  ;;  %v1791_v22 = vpop.f32.mrb[1].mxu1 }
 0x200   : > { %v1792_v15 = vadd.f32 %v3420_v29, %v1791_v22 }
 0x201   : > { %1927 = vst [vmem:[%s3424_s9 + $0x38] sm:$0xff] %v1797_v14 }
 0x202   : > { %1926 = vst [vmem:[%s3424_s9 + $0x30] sm:$0xff] %v1792_v15 }
 0x208   : > { %v2256_v45 = vpop.f32.mrb[2].mxu1 }
 0x209   : > { %v1807_v6 = vadd.f32 %v2256_v45, %v3420_v29  ;;  %v1801_v38 = vpop.f32.mrb[3].mxu1 }
 0x20a   : > { %v1802_v42 = vadd.f32 %v3420_v29, %v1801_v38 }
 0x20b   : > { %1929 = vst [vmem:[%s3424_s9 + $0x48] sm:$0xff] %v1807_v6 }
 0x20c   : > { %1928 = vst [vmem:[%s3424_s9 + $0x40] sm:$0xff] %v1802_v42 }
 0x212   : > { %v2259_v59 = vpop.f32.mrb[4].mxu1 }
 0x213   : > { %v1817_v9 = vadd.f32 %v2259_v59, %v3420_v29  ;;  %v1811_v7 = vpop.f32.mrb[5].mxu1 }
 0x214   : > { %v1812_v41 = vadd.f32 %v3420_v29, %v1811_v7 }
 0x215   : > { %1931 = vst [vmem:[%s3424_s9 + $0x58] sm:$0xff] %v1817_v9 }
 0x216   : > { %1930 = vst [vmem:[%s3424_s9 + $0x50] sm:$0xff] %v1812_v41 }
 0x21c   : > { %v2262_v62 = vpop.f32.mrb[6].mxu1 }
 0x21d   : > { %v1827_v56 = vadd.f32 %v2262_v62, %v3420_v29  ;;  %v1821_v11 = vpop.f32.mrb[7].mxu1 }
 0x21e   : > { %v1822_v63 = vadd.f32 %v3420_v29, %v1821_v11 }
 0x21f   : > { %1933 = vst [vmem:[%s3424_s9 + $0x68] sm:$0xff] %v1827_v56 }
 0x220   : > { %1932 = vst [vmem:[%s3424_s9 + $0x60] sm:$0xff] %v1822_v63 }
 0x226   : > { %v2265_v61 = vpop.f32.mrb[8].mxu1 }
 0x227   : > { %v1837_v2 = vadd.f32 %v2265_v61, %v3420_v29  ;;  %v1831_v13 = vpop.f32.mrb[9].mxu1 }
 0x228   : > { %v1832_v28 = vadd.f32 %v3420_v29, %v1831_v13 }
 0x229   : > { %1935 = vst [vmem:[%s3424_s9 + $0x78] sm:$0xff] %v1837_v2 }
 0x22a   : > { %1934 = vst [vmem:[%s3424_s9 + $0x70] sm:$0xff] %v1832_v28 }
 0x230   : > { %v2268_v46 = vpop.f32.mrb[10].mxu1 }
 0x231   : > { %v1847_v55 = vadd.f32 %v2268_v46, %v3420_v29  ;;  %v1841_v5 = vpop.f32.mrb[11].mxu1 }
 0x232   : > { %v1842_v12 = vadd.f32 %v3420_v29, %v1841_v5 }
 0x233   : > { %1937 = vst [vmem:[%s3424_s9 + $0x88] sm:$0xff] %v1847_v55 }
 0x234   : > { %1936 = vst [vmem:[%s3424_s9 + $0x80] sm:$0xff] %v1842_v12 }
 0x239   : > { %v2271_v17 = vpop.f32.mrb[12].mxu1 }
 0x23a   : > { %v1857_v23 = vadd.f32 %v2271_v17, %v3420_v29  ;;  %v1851_v8 = vpop.f32.mrb[13].mxu1 }
 0x23b   : > { %v1852_v24 = vadd.f32 %v3420_v29, %v1851_v8 }
 0x23c   : > { %1939 = vst [vmem:[%s3424_s9 + $0x98] sm:$0xff] %v1857_v23 }
 0x23d   : > { %1938 = vst [vmem:[%s3424_s9 + $0x90] sm:$0xff] %v1852_v24 }
 0x243   : > { %v2274_v33 = vpop.f32.mrb[14].mxu1 }
 0x244   : > { %v1867_v37 = vadd.f32 %v2274_v33, %v3420_v29  ;;  %v1861_v52 = vpop.f32.mrb[15].mxu1 }
 0x245   : > { %v1862_v32 = vadd.f32 %v3420_v29, %v1861_v52 }
 0x246   : > { %1941 = vst [vmem:[%s3424_s9 + $0xa8] sm:$0xff] %v1867_v37 }
 0x247   : > { %1940 = vst [vmem:[%s3424_s9 + $0xa0] sm:$0xff] %v1862_v32 }
 0x24c   : > { %v2277_v19 = vpop.f32.mrb[16].mxu1 }
 0x24d   : > { %v1877_v34 = vadd.f32 %v2277_v19, %v3420_v29  ;;  %v1871_v25 = vpop.f32.mrb[17].mxu1 }
 0x24e   : > { %v1872_v43 = vadd.f32 %v3420_v29, %v1871_v25 }
 0x24f   : > { %1943 = vst [vmem:[%s3424_s9 + $0xb8] sm:$0xff] %v1877_v34 }
 0x250   : > { %1942 = vst [vmem:[%s3424_s9 + $0xb0] sm:$0xff] %v1872_v43 }
 0x256   : > { %v2280_v50 = vpop.f32.mrb[18].mxu1 }
 0x257   : > { %v1887_v39 = vadd.f32 %v2280_v50, %v3420_v29  ;;  %v1881_v54 = vpop.f32.mrb[19].mxu1 }
 0x258   : > { %v1882_v4 = vadd.f32 %v3420_v29, %v1881_v54 }
 0x259   : > { %1945 = vst [vmem:[%s3424_s9 + $0xc8] sm:$0xff] %v1887_v39 }
 0x25a   : > { %1944 = vst [vmem:[%s3424_s9 + $0xc0] sm:$0xff] %v1882_v4 }
 0x25f   : > { %v2283_v0 = vpop.f32.mrb[20].mxu1 }
 0x260   : > { %v1897_v20 = vadd.f32 %v2283_v0, %v3420_v29  ;;  %v1891_v27 = vpop.f32.mrb[21].mxu1 }
 0x261   : > { %v1892_v36 = vadd.f32 %v3420_v29, %v1891_v27 }
 0x262   : > { %1947 = vst [vmem:[%s3424_s9 + $0xd8] sm:$0xff] %v1897_v20 }
 0x263   : > { %1946 = vst [vmem:[%s3424_s9 + $0xd0] sm:$0xff] %v1892_v36 }
 0x269   : > { %v2286_v58 = vpop.f32.mrb[22].mxu1 }
 0x26a   : > { %v1907_v57 = vadd.f32 %v2286_v58, %v3420_v29  ;;  %v1901_v60 = vpop.f32.mrb[23].mxu1 }
 0x26b   : > { %v1902_v53 = vadd.f32 %v3420_v29, %v1901_v60 }
 0x26c   : > { %1949 = vst [vmem:[%s3424_s9 + $0xe8] sm:$0xff] %v1907_v57 }
 0x26d   : > { %1948 = vst [vmem:[%s3424_s9 + $0xe0] sm:$0xff] %v1902_v53 }
 0x272   : > { %v2289_v30 = vpop.f32.mrb[24].mxu1 }
 0x273   : > { %v1917_v26 = vadd.f32 %v2289_v30, %v3420_v29  ;;  %v1911_v18 = vpop.f32.mrb[25].mxu1 }
 0x274   : > { %v1912_v40 = vadd.f32 %v3420_v29, %v1911_v18 }
 0x275   : > { %1951 = vst [vmem:[%s3424_s9 + $0xf8] sm:$0xff] %v1917_v26 }
 0x276   : > { %1950 = vst [vmem:[%s3424_s9 + $0xf0] sm:$0xff] %v1912_v40 }
 0x277   : > { %2396 = shalt.err (!%p2393_p3)
}
 0x278   : > { %s2397_s22 = scalar_lea.hbm %s3490_s17, 4096  ;;  %s2401_s8 = scalar_lea.hbm %s3547_s7, 8192 }
 0x279   : > { %p2398_p4 = scmp.ne.s32.totalorder %s3490_s17, %s2397_s22  ;;  %p2402_p9 = scmp.lt.u32.totalorder %s3490_s17, %s3547_s7 }
 0x27a   : > { %p2403_p10 = scmp.lt.u32.totalorder %s2401_s8, %s2397_s22  ;;  %p2405_p12 = scmp.lt.u32.totalorder %s2397_s22, %s3490_s17 }
 0x27b   : > { %p2399_p7 = pnand %p2398_p4, %p2529_p5 }
 0x27c   : > { %p2404_p11 = por %p2403_p10, %p2402_p9 }
 0x27d   : > { %p2400_p8 = pneg %p2399_p7 }
 0x27e   : > { %p2406_p13 = por %p2405_p12, %p2404_p11 }
 0x280   : > { %p2407_p0 = pnand %p2406_p13, %p2400_p8 }
 0x282   : > { %2410 = shalt.err (!%p2407_p0)
}
 0x283   : > { %s2449_s15 = smov 128   ;;  %s2450_s16 = smov 8  }
 0x284   : > { %2338 = dma.vmem_to_hbm [thread:$0]  (%p2529_p5), %s3492_s14, 4096, %s3490_s17, %s3499_s28, %s2449_s15, %s2449_s15, %s2450_s16  }
 0x285 PF: > { %p2344_p1 = scmp.ge.s32.totalorder %s2445_s27, 2  ;;  %s1981_s18 = sand.u32 1, %s2433_s24  }
 0x286   : > { %s1982_s19 = scalar_lea.sflag [#allocation4], %s1981_s18 }
 0x287   : > { %p2341_p2 = pnand %p2344_p1, %p2533_p6 }
 0x289   : > { %2428 = dma.done.wait (!%p2341_p2), %s1982_s19, 4096  }
 0x28a   : > { %2430 = vsyncadd (!%p2341_p2), %s1982_s19, 4294963200  ;;  %p17_p3 = scmp.ge.s32.totalorder %s2516_s30, 4   ;;  %s3550_s24 = smov %s2437_s25 }
 0x28b   : > { %s3551_s25 = smov %s2441_s26  ;;  %s3552_s26 = smov %s2527_s10 }
 0x28c   : > { %s3553_s27 = smov %s2516_s30  ;;  %19 = sbr.rel (!%p17_p3) target bundleno = 3 (0x3), region = 85 }
 0x293   :  { %1987 = vsyncpa [#allocation4], 1 }
 0x294   :  { %1989 = vsyncpa [#allocation4 + $0x1], 1 }

</bundles_post_ra>
